<compile_context>
chip_gen: v7x
topology: tpu7x:2x2x1
jax: 0.10.0
libtpu: 0.0.40
codegen_flags: <defaults>
</compile_context>

<pallas_src>
import jax
import jax.numpy as jnp
from jax.experimental import pallas as pl
from jax.experimental.pallas import tpu as pltpu

LANE = 128


def _bottleneck_kernel(x_ref, w1_ref, b1_ref, w2_ref, b2_ref, w3_ref, b3_ref,
                       o_ref):
    """One image per grid step; whole bottleneck fused in VMEM (NHWC)."""
    _, H, W, Cin = x_ref.shape
    wp = w1_ref.shape[1]                      # lane-padded conv width
    Cout = w3_ref.shape[1]
    M = H * W

    x_bf = x_ref[0].reshape(M, Cin)           # bf16, channels on the lane axis

    # ---- conv1 (1x1) + bn1 (scale folded into w1) + relu : one MXU matmul ----
    h1 = jnp.dot(x_bf, w1_ref[...], preferred_element_type=jnp.float32)
    h1b = jnp.maximum(h1 + b1_ref[...], 0.0).astype(jnp.bfloat16)

    # ---- conv2 (3x3, stride=1, pad=1) + bn2 + relu ----
    # dy taps built as values (row shift by W with zero halo rows), fused along
    # the K axis (lane-aligned 128-wide slabs) -> a single deep MXU matmul.
    zrows = jnp.zeros((W, wp), jnp.bfloat16)
    up = jnp.concatenate([zrows, h1b[:M - W]], axis=0)      # dy = 0 -> in[h-1, w]
    down = jnp.concatenate([h1b[W:], zrows], axis=0)        # dy = 2 -> in[h+1, w]
    lhs = jnp.concatenate([up, h1b, down], axis=1)          # (M, 3*wp)

    p = jnp.dot(lhs, w2_ref[...], preferred_element_type=jnp.float32)  # (M, 3*wp)
    p_left = p[:, :wp]                # dx = 0 partial, evaluated at column w
    p_mid = p[:, wp:2 * wp]           # dx = 1
    p_right = p[:, 2 * wp:]           # dx = 2

    # dx taps: shift the matmul outputs by one spatial position along the
    # flattened H*W axis and zero the image-column boundaries.
    zrow1 = jnp.zeros((1, wp), jnp.float32)
    left = jnp.concatenate([zrow1, p_left[:M - 1]], axis=0)      # p_left at w-1
    right = jnp.concatenate([p_right[1:], zrow1], axis=0)        # p_right at w+1
    col = jax.lax.broadcasted_iota(jnp.int32, (M, wp), 0) % W
    left = jnp.where(col == 0, 0.0, left)
    right = jnp.where(col == W - 1, 0.0, right)
    h2b = jnp.maximum(p_mid + left + right + b2_ref[...], 0.0).astype(jnp.bfloat16)

    # ---- conv3 (1x1) + bn3 + residual add + relu ----
    h3 = jnp.dot(h2b, w3_ref[...], preferred_element_type=jnp.float32) + b3_ref[...]
    # Residual re-read at the point of use (no long f32 live range across the
    # matmuls); math in f32, store in the (bf16) output dtype.
    identity = x_ref[0].reshape(M, Cin).astype(jnp.float32)
    o_ref[0] = (jnp.maximum(h3 + identity, 0.0)
                .astype(o_ref.dtype).reshape(H, W, Cout))


def bottleneck_forward_nhwc(x_nhwc, prepared_params, out_dtype=jnp.bfloat16):
    """x_nhwc: (N, H, W, C).  Returns NHWC in `out_dtype` (bf16 by default)."""
    w1, b1, w2cat, b2, w3, b3 = prepared_params
    x = x_nhwc.astype(jnp.bfloat16)
    N, H, W, Cin = x.shape
    wp = w1.shape[1]
    Cout = w3.shape[1]
    if Cin != Cout:
        raise ValueError(
            "identity residual requires in_channel == out_channel * expansion "
            f"(got Cin={Cin}, Cout={Cout}); downsample branch not implemented")

    # Explicit VMEM budget: double-buffered x / output blocks, resident weights
    # (default double-buffered) and the major live f32/bf16 temporaries.
    M = H * W
    out_isz = jnp.dtype(out_dtype).itemsize
    block_bytes = (
        2 * (M * Cin) * 2                                  # x blocks (bf16)
        + 2 * (M * Cout) * out_isz                         # output blocks
        + 2 * ((Cin * wp + 9 * wp * wp + wp * Cout) * 2    # weights (bf16)
               + (2 * wp + Cout) * 4)                      # biases (f32)
        + (M * wp) * 4                                     # h1
        + (M * 3 * wp) * (2 + 4)                           # lhs (bf16) + p (f32)
        + 2 * (M * wp) * 4                                 # shifted dx partials
        + (M * max(wp, Cout)) * 4                          # h2/h3/identity (approx)
    )
    # TODO(synk): on v5e/v6e (128 MiB physical VMEM) this cap can be raised to
    # ~96 MiB for bigger spatial blocks; 48 MiB keeps headroom on v7x (64 MiB).
    vmem_limit = int(min(max(int(1.5 * block_bytes), 16 * 2**20), 48 * 2**20))

    grid_spec = pltpu.PrefetchScalarGridSpec(
        num_scalar_prefetch=0,
        grid=(N,),
        in_specs=[
            pl.BlockSpec((1, H, W, Cin), lambda n: (n, 0, 0, 0)),     # x
            pl.BlockSpec((Cin, wp), lambda n: (0, 0)),                # w1 (bn1 folded)
            pl.BlockSpec((1, wp), lambda n: (0, 0)),                  # bn1 bias
            pl.BlockSpec((3 * wp, 3 * wp), lambda n: (0, 0)),         # w2 (dy-concat)
            pl.BlockSpec((1, wp), lambda n: (0, 0)),                  # bn2 bias
            pl.BlockSpec((wp, Cout), lambda n: (0, 0)),               # w3 (bn3 folded)
            pl.BlockSpec((1, Cout), lambda n: (0, 0)),                # bn3 bias
        ],
        out_specs=pl.BlockSpec((1, H, W, Cout), lambda n: (n, 0, 0, 0)),
    )
    return pl.pallas_call(
        _bottleneck_kernel,
        out_shape=jax.ShapeDtypeStruct((N, H, W, Cout), out_dtype),
        grid_spec=grid_spec,
        compiler_params=pltpu.CompilerParams(
            dimension_semantics=("parallel",),
            vmem_limit_bytes=vmem_limit),
    )(x, w1, b1, w2cat, b2, w3, b3)


def bottleneck_forward(x_nchw, prepared_params, out_dtype=jnp.bfloat16):
    """PyTorch-layout wrapper: (N, C, H, W) in / out.  Output is bf16."""
    x = jnp.transpose(x_nchw, (0, 2, 3, 1))
    out = bottleneck_forward_nhwc(x, prepared_params, out_dtype=out_dtype)
    return jnp.transpose(out, (0, 3, 1, 2))


def prepare_params(raw_params, lane=LANE):
    """Fold BN scales into the conv weights, lane-pad the conv width to a
    multiple of 128, build the dy-concatenated 3x3 weight, cast MXU inputs to
    bf16.  Done once, outside the kernel."""
    w1, s1, b1, w2, s2, b2, w3, s3, b3 = raw_params
    cin, width = w1.shape
    cout = w3.shape[1]
    wp = ((width + lane - 1) // lane) * lane

    w1s = (w1 * s1).astype(jnp.float32)                  # (cin, width)
    w2s = (w2 * s2).astype(jnp.float32)                  # (9, width, width)
    w3s = (w3 * s3).astype(jnp.float32)                  # (width, cout)

    # Zero-padded extra channels: ReLU(0)=0 and zero weight rows keep them inert.
    w1p = jnp.zeros((cin, wp), jnp.float32).at[:, :width].set(w1s)
    b1p = jnp.zeros((1, wp), jnp.float32).at[:, :width].set(b1.reshape(1, width))
    w2p = jnp.zeros((9, wp, wp), jnp.float32).at[:, :width, :width].set(w2s)
    b2p = jnp.zeros((1, wp), jnp.float32).at[:, :width].set(b2.reshape(1, width))
    w3p = jnp.zeros((wp, cout), jnp.float32).at[:width, :].set(w3s)

    # Rows ordered by dy block, columns ordered by dx block.
    w2cat = (w2p.reshape(3, 3, wp, wp)
             .transpose(0, 2, 1, 3)
             .reshape(3 * wp, 3 * wp))

    return (w1p.astype(jnp.bfloat16), b1p,
            w2cat.astype(jnp.bfloat16), b2p,
            w3p.astype(jnp.bfloat16), b3.reshape(1, cout).astype(jnp.float32))


def bottleneck_reference(x_nchw, raw_params):
    """Pure-JAX reference emulating the kernel's bf16/f32 mixed precision."""
    w1, s1, b1, w2, s2, b2, w3, s3, b3 = raw_params
    x = jnp.transpose(x_nchw, (0, 2, 3, 1)).astype(jnp.bfloat16)
    identity = x.astype(jnp.float32)
    N, H, W, _ = x.shape
    width = w1.shape[1]
    w1s = (w1 * s1).astype(jnp.bfloat16)
    w2s = (w2 * s2).astype(jnp.bfloat16)
    w3s = (w3 * s3).astype(jnp.bfloat16)

    h1 = jnp.maximum(jnp.einsum('nhwc,cd->nhwd', x, w1s,
                                preferred_element_type=jnp.float32) + b1, 0.0)
    h1b = h1.astype(jnp.bfloat16)
    hp = jnp.pad(h1b, ((0, 0), (1, 1), (1, 1), (0, 0)))
    acc = jnp.zeros((N, H, W, width), jnp.float32)
    for dy in range(3):
        for dx in range(3):
            acc = acc + jnp.einsum('nhwc,cd->nhwd',
                                   hp[:, dy:dy + H, dx:dx + W, :],
                                   w2s[dy * 3 + dx],
                                   preferred_element_type=jnp.float32)
    h2 = jnp.maximum(acc + b2, 0.0).astype(jnp.bfloat16)
    h3 = jnp.einsum('nhwc,cd->nhwd', h2, w3s,
                    preferred_element_type=jnp.float32) + b3
    out = jnp.maximum(h3 + identity, 0.0)
    return jnp.transpose(out, (0, 3, 1, 2))


def init_params(key, in_channel, out_channel, groups=1, width_per_group=64):
    """Deterministic synthetic parameters (shapes follow Bottleneck.__init__)."""
    width = int(out_channel * (width_per_group / 64.0)) * groups
    cout = out_channel * 4                       # expansion = 4
    keys = jax.random.split(key, 15)

    def bn_fold(kg, kb, km, kv, c):
        gamma = jax.random.uniform(kg, (c,), minval=0.5, maxval=1.5)
        beta = 0.1 * jax.random.normal(kb, (c,))
        rmean = 0.1 * jax.random.normal(km, (c,))
        rvar = jax.random.uniform(kv, (c,), minval=0.5, maxval=1.5)
        scale = gamma / jnp.sqrt(rvar + 1e-5)
        bias = beta - rmean * scale
        return (scale.reshape(1, c).astype(jnp.float32),
                bias.reshape(1, c).astype(jnp.float32))

    # conv weights stored pre-transposed for channels-last matmuls:
    w1 = (0.1 * jax.random.normal(keys[0], (in_channel, width))).astype(jnp.float32)
    w2 = (0.1 * jax.random.normal(keys[1], (9, width, width))).astype(jnp.float32)
    w3 = (0.1 * jax.random.normal(keys[2], (width, cout))).astype(jnp.float32)
    s1, b1 = bn_fold(keys[3], keys[4], keys[5], keys[6], width)
    s2, b2 = bn_fold(keys[7], keys[8], keys[9], keys[10], width)
    s3, b3 = bn_fold(keys[11], keys[12], keys[13], keys[14], cout)
    return (w1, s1, b1, w2, s2, b2, w3, s3, b3)


if __name__ == "__main__":
    key = jax.random.PRNGKey(0)
    k_x, k_p = jax.random.split(key)

    # downsample=None requires in_channel == out_channel * expansion
    out_channel = 4
    in_channel = out_channel * 4      # 16
    N, H, W = 2, 16, 16

    x = jax.random.normal(k_x, (N, in_channel, H, W), dtype=jnp.float32)  # NCHW
    raw = init_params(k_p, in_channel, out_channel)
    prepped = prepare_params(raw)

    out = jax.jit(bottleneck_forward)(x, prepped)
    out = jax.block_until_ready(out)
    assert out.shape == (N, out_channel * 4, H, W), out.shape

    ref = bottleneck_reference(x, raw)
    # Kernel writes bf16 output; compare against the bf16-rounded reference.
    ref_bf = ref.astype(jnp.bfloat16).astype(jnp.float32)
    out_f = out.astype(jnp.float32)
    max_err = float(jnp.max(jnp.abs(out_f - ref_bf)))
    assert jnp.allclose(out_f, ref_bf, rtol=2e-2, atol=2e-2), max_err
    print("KERNEL_OK")
</pallas_src>

<mosaic_0001>
module attributes {stable_mosaic.version = 11 : i64} {
  func.func @_bottleneck_kernel(%arg0: i32, %arg1: memref<1x16x16x16xbf16, #tpu.memory_space<vmem>>, %arg2: memref<16x128xbf16, #tpu.memory_space<vmem>>, %arg3: memref<1x128xf32, #tpu.memory_space<vmem>>, %arg4: memref<384x384xbf16, #tpu.memory_space<vmem>>, %arg5: memref<1x128xf32, #tpu.memory_space<vmem>>, %arg6: memref<128x16xbf16, #tpu.memory_space<vmem>>, %arg7: memref<1x16xf32, #tpu.memory_space<vmem>>, %arg8: memref<1x16x16x16xbf16, #tpu.memory_space<vmem>>) attributes {dimension_semantics = [#tpu.dimension_semantics<parallel>], iteration_bounds = array<i64: 2>, scalar_prefetch = 0 : i64, scratch_operands = 0 : i64, tpu.core_type = #tpu.core_type<tc>, window_params = [{transform_indices = @transform_0, window_bounds = array<i64: 1, 16, 16, 16>}, {pipeline_mode = #tpu.pipeline_mode<synchronous>, transform_indices = @transform_1, window_bounds = array<i64: 16, 128>}, {pipeline_mode = #tpu.pipeline_mode<synchronous>, transform_indices = @transform_2, window_bounds = array<i64: 1, 128>}, {pipeline_mode = #tpu.pipeline_mode<synchronous>, transform_indices = @transform_3, window_bounds = array<i64: 384, 384>}, {pipeline_mode = #tpu.pipeline_mode<synchronous>, transform_indices = @transform_4, window_bounds = array<i64: 1, 128>}, {pipeline_mode = #tpu.pipeline_mode<synchronous>, transform_indices = @transform_5, window_bounds = array<i64: 128, 16>}, {pipeline_mode = #tpu.pipeline_mode<synchronous>, transform_indices = @transform_6, window_bounds = array<i64: 1, 16>}, {transform_indices = @transform_7, window_bounds = array<i64: 1, 16, 16, 16>}]} {
    %c0 = arith.constant 0 : index
    %c0_0 = arith.constant 0 : index
    %c0_1 = arith.constant 0 : index
    %c0_2 = arith.constant 0 : index
    %0 = vector.load %arg1[%c0, %c0_0, %c0_1, %c0_2] : memref<1x16x16x16xbf16, #tpu.memory_space<vmem>>, vector<1x16x16x16xbf16>
    %1 = vector.shape_cast %0 : vector<1x16x16x16xbf16> to vector<16x16x16xbf16>
    %2 = vector.shape_cast %1 : vector<16x16x16xbf16> to vector<256x16xbf16>
    %c0_3 = arith.constant 0 : index
    %c0_4 = arith.constant 0 : index
    %3 = vector.load %arg2[%c0_3, %c0_4] : memref<16x128xbf16, #tpu.memory_space<vmem>>, vector<16x128xbf16>
    %cst = arith.constant dense<0.000000e+00> : vector<256x128xf32>
    %4 = tpu.matmul %2, %3, %cst {dimension_numbers = #tpu.dot_dimension_numbers<[1], [0], [0], [1], [0, 0, 1, 1], [], []>} : vector<256x16xbf16>, vector<16x128xbf16>, vector<256x128xf32> -> vector<256x128xf32>
    %c0_5 = arith.constant 0 : index
    %c0_6 = arith.constant 0 : index
    %5 = vector.load %arg3[%c0_5, %c0_6] : memref<1x128xf32, #tpu.memory_space<vmem>>, vector<1x128xf32>
    %6 = vector.broadcast %5 : vector<1x128xf32> to vector<256x128xf32>
    %7 = arith.addf %4, %6 : vector<256x128xf32>
    %cst_7 = arith.constant 0.000000e+00 : f32
    %8 = vector.broadcast %cst_7 : f32 to vector<256x128xf32>
    %9 = arith.maximumf %7, %8 : vector<256x128xf32>
    %10 = arith.truncf %9 : vector<256x128xf32> to vector<256x128xbf16>
    %cst_8 = arith.constant 0.000000e+00 : bf16
    %11 = vector.broadcast %cst_8 : bf16 to vector<16x128xbf16>
    %12 = vector.extract_strided_slice %10 {offsets = [0, 0], sizes = [240, 128], strides = [1, 1]} : vector<256x128xbf16> to vector<240x128xbf16>
    %13 = tpu.concatenate %11, %12 in 0 : vector<16x128xbf16>, vector<240x128xbf16> -> vector<256x128xbf16>
    %14 = vector.extract_strided_slice %10 {offsets = [16, 0], sizes = [240, 128], strides = [1, 1]} : vector<256x128xbf16> to vector<240x128xbf16>
    %15 = tpu.concatenate %14, %11 in 0 : vector<240x128xbf16>, vector<16x128xbf16> -> vector<256x128xbf16>
    %16 = tpu.concatenate %13, %10, %15 in 1 : vector<256x128xbf16>, vector<256x128xbf16>, vector<256x128xbf16> -> vector<256x384xbf16>
    %c0_9 = arith.constant 0 : index
    %c0_10 = arith.constant 0 : index
    %17 = vector.load %arg4[%c0_9, %c0_10] : memref<384x384xbf16, #tpu.memory_space<vmem>>, vector<384x384xbf16>
    %cst_11 = arith.constant dense<0.000000e+00> : vector<256x384xf32>
    %18 = tpu.matmul %16, %17, %cst_11 {dimension_numbers = #tpu.dot_dimension_numbers<[1], [0], [0], [1], [0, 0, 1, 1], [], []>} : vector<256x384xbf16>, vector<384x384xbf16>, vector<256x384xf32> -> vector<256x384xf32>
    %19 = vector.extract_strided_slice %18 {offsets = [0, 0], sizes = [256, 128], strides = [1, 1]} : vector<256x384xf32> to vector<256x128xf32>
    %20 = vector.extract_strided_slice %18 {offsets = [0, 128], sizes = [256, 128], strides = [1, 1]} : vector<256x384xf32> to vector<256x128xf32>
    %21 = vector.extract_strided_slice %18 {offsets = [0, 256], sizes = [256, 128], strides = [1, 1]} : vector<256x384xf32> to vector<256x128xf32>
    %cst_12 = arith.constant 0.000000e+00 : f32
    %22 = vector.broadcast %cst_12 : f32 to vector<1x128xf32>
    %23 = vector.extract_strided_slice %19 {offsets = [0, 0], sizes = [255, 128], strides = [1, 1]} : vector<256x128xf32> to vector<255x128xf32>
    %24 = tpu.concatenate %22, %23 in 0 : vector<1x128xf32>, vector<255x128xf32> -> vector<256x128xf32>
    %25 = vector.extract_strided_slice %21 {offsets = [1, 0], sizes = [255, 128], strides = [1, 1]} : vector<256x128xf32> to vector<255x128xf32>
    %26 = tpu.concatenate %25, %22 in 0 : vector<255x128xf32>, vector<1x128xf32> -> vector<256x128xf32>
    %27 = tpu.iota {dimensions = array<i32: 0>} : vector<256x128xi32>
    %c16_i32 = arith.constant 16 : i32
    %c0_i32 = arith.constant 0 : i32
    %28 = arith.cmpi eq, %c16_i32, %c0_i32 : i32
    %c1_i32 = arith.constant 1 : i32
    %29 = arith.select %28, %c1_i32, %c16_i32 : i32
    %30 = vector.broadcast %29 : i32 to vector<256x128xi32>
    %31 = arith.remsi %27, %30 : vector<256x128xi32>
    %c0_i32_13 = arith.constant 0 : i32
    %32 = vector.broadcast %c0_i32_13 : i32 to vector<256x128xi32>
    %33 = arith.cmpi ne, %31, %32 : vector<256x128xi32>
    %c0_i32_14 = arith.constant 0 : i32
    %34 = vector.broadcast %c0_i32_14 : i32 to vector<256x128xi32>
    %35 = arith.cmpi slt, %31, %34 : vector<256x128xi32>
    %c0_i32_15 = arith.constant 0 : i32
    %36 = arith.cmpi slt, %29, %c0_i32_15 : i32
    %37 = vector.broadcast %36 : i1 to vector<256x128xi1>
    %38 = vector.broadcast %37 : vector<256x128xi1> to vector<256x128xi1>
    %39 = arith.xori %35, %38 : vector<256x128xi1>
    %40 = arith.andi %39, %33 : vector<256x128xi1>
    %41 = vector.broadcast %29 : i32 to vector<256x128xi32>
    %42 = arith.addi %31, %41 : vector<256x128xi32>
    %43 = arith.select %40, %42, %31 : vector<256x128xi1>, vector<256x128xi32>
    %c0_i32_16 = arith.constant 0 : i32
    %44 = vector.broadcast %c0_i32_16 : i32 to vector<256x128xi32>
    %45 = arith.cmpi eq, %43, %44 : vector<256x128xi32>
    %cst_17 = arith.constant 0.000000e+00 : f32
    %46 = vector.broadcast %cst_17 : f32 to vector<256x128xf32>
    %47 = arith.select %45, %46, %24 : vector<256x128xi1>, vector<256x128xf32>
    %c15_i32 = arith.constant 15 : i32
    %48 = vector.broadcast %c15_i32 : i32 to vector<256x128xi32>
    %49 = arith.cmpi eq, %43, %48 : vector<256x128xi32>
    %cst_18 = arith.constant 0.000000e+00 : f32
    %50 = vector.broadcast %cst_18 : f32 to vector<256x128xf32>
    %51 = arith.select %49, %50, %26 : vector<256x128xi1>, vector<256x128xf32>
    %52 = arith.addf %20, %47 : vector<256x128xf32>
    %53 = arith.addf %52, %51 : vector<256x128xf32>
    %c0_19 = arith.constant 0 : index
    %c0_20 = arith.constant 0 : index
    %54 = vector.load %arg5[%c0_19, %c0_20] : memref<1x128xf32, #tpu.memory_space<vmem>>, vector<1x128xf32>
    %55 = vector.broadcast %54 : vector<1x128xf32> to vector<256x128xf32>
    %56 = arith.addf %53, %55 : vector<256x128xf32>
    %cst_21 = arith.constant 0.000000e+00 : f32
    %57 = vector.broadcast %cst_21 : f32 to vector<256x128xf32>
    %58 = arith.maximumf %56, %57 : vector<256x128xf32>
    %59 = arith.truncf %58 : vector<256x128xf32> to vector<256x128xbf16>
    %c0_22 = arith.constant 0 : index
    %c0_23 = arith.constant 0 : index
    %60 = vector.load %arg6[%c0_22, %c0_23] : memref<128x16xbf16, #tpu.memory_space<vmem>>, vector<128x16xbf16>
    %cst_24 = arith.constant dense<0.000000e+00> : vector<256x16xf32>
    %61 = tpu.matmul %59, %60, %cst_24 {dimension_numbers = #tpu.dot_dimension_numbers<[1], [0], [0], [1], [0, 0, 1, 1], [], []>} : vector<256x128xbf16>, vector<128x16xbf16>, vector<256x16xf32> -> vector<256x16xf32>
    %c0_25 = arith.constant 0 : index
    %c0_26 = arith.constant 0 : index
    %62 = vector.load %arg7[%c0_25, %c0_26] : memref<1x16xf32, #tpu.memory_space<vmem>>, vector<1x16xf32>
    %63 = vector.broadcast %62 : vector<1x16xf32> to vector<256x16xf32>
    %64 = arith.addf %61, %63 : vector<256x16xf32>
    %c0_27 = arith.constant 0 : index
    %c0_28 = arith.constant 0 : index
    %c0_29 = arith.constant 0 : index
    %c0_30 = arith.constant 0 : index
    %65 = vector.load %arg1[%c0_27, %c0_28, %c0_29, %c0_30] : memref<1x16x16x16xbf16, #tpu.memory_space<vmem>>, vector<1x16x16x16xbf16>
    %66 = vector.shape_cast %65 : vector<1x16x16x16xbf16> to vector<16x16x16xbf16>
    %67 = vector.shape_cast %66 : vector<16x16x16xbf16> to vector<256x16xbf16>
    %68 = arith.extf %67 : vector<256x16xbf16> to vector<256x16xf32>
    %69 = arith.addf %64, %68 : vector<256x16xf32>
    %cst_31 = arith.constant 0.000000e+00 : f32
    %70 = vector.broadcast %cst_31 : f32 to vector<256x16xf32>
    %71 = arith.maximumf %69, %70 : vector<256x16xf32>
    %72 = arith.truncf %71 : vector<256x16xf32> to vector<256x16xbf16>
    %73 = vector.shape_cast %72 : vector<256x16xbf16> to vector<16x16x16xbf16>
    %c0_32 = arith.constant 0 : index
    %c0_33 = arith.constant 0 : index
    %c0_34 = arith.constant 0 : index
    %c0_35 = arith.constant 0 : index
    %74 = vector.load %arg8[%c0_32, %c0_33, %c0_34, %c0_35] : memref<1x16x16x16xbf16, #tpu.memory_space<vmem>>, vector<1x16x16x16xbf16>
    %75 = vector.shape_cast %74 : vector<1x16x16x16xbf16> to vector<16x16x16xbf16>
    %76 = vector.shape_cast %73 : vector<16x16x16xbf16> to vector<1x16x16x16xbf16>
    tpu.vector_store %arg8[%c0_32, %c0_33, %c0_34, %c0_35], %76 {strides = array<i32>} : memref<1x16x16x16xbf16, #tpu.memory_space<vmem>>, vector<1x16x16x16xbf16>,
    return
  }
  func.func @transform_0(%arg0: i32) -> (i32, i32, i32, i32) {
    %c0_i32 = arith.constant 0 : i32
    %c0_i32_0 = arith.constant 0 : i32
    %c0_i32_1 = arith.constant 0 : i32
    %c0_i32_2 = arith.constant 0 : i32
    return %arg0, %c0_i32, %c0_i32_0, %c0_i32_1 : i32, i32, i32, i32
  }
  func.func @transform_1(%arg0: i32) -> (i32, i32) {
    %c0_i32 = arith.constant 0 : i32
    %c0_i32_0 = arith.constant 0 : i32
    %c0_i32_1 = arith.constant 0 : i32
    return %c0_i32, %c0_i32_0 : i32, i32
  }
  func.func @transform_2(%arg0: i32) -> (i32, i32) {
    %c0_i32 = arith.constant 0 : i32
    %c0_i32_0 = arith.constant 0 : i32
    %c0_i32_1 = arith.constant 0 : i32
    return %c0_i32, %c0_i32_0 : i32, i32
  }
  func.func @transform_3(%arg0: i32) -> (i32, i32) {
    %c0_i32 = arith.constant 0 : i32
    %c0_i32_0 = arith.constant 0 : i32
    %c0_i32_1 = arith.constant 0 : i32
    return %c0_i32, %c0_i32_0 : i32, i32
  }
  func.func @transform_4(%arg0: i32) -> (i32, i32) {
    %c0_i32 = arith.constant 0 : i32
    %c0_i32_0 = arith.constant 0 : i32
    %c0_i32_1 = arith.constant 0 : i32
    return %c0_i32, %c0_i32_0 : i32, i32
  }
  func.func @transform_5(%arg0: i32) -> (i32, i32) {
    %c0_i32 = arith.constant 0 : i32
    %c0_i32_0 = arith.constant 0 : i32
    %c0_i32_1 = arith.constant 0 : i32
    return %c0_i32, %c0_i32_0 : i32, i32
  }
  func.func @transform_6(%arg0: i32) -> (i32, i32) {
    %c0_i32 = arith.constant 0 : i32
    %c0_i32_0 = arith.constant 0 : i32
    %c0_i32_1 = arith.constant 0 : i32
    return %c0_i32, %c0_i32_0 : i32, i32
  }
  func.func @transform_7(%arg0: i32) -> (i32, i32, i32, i32) {
    %c0_i32 = arith.constant 0 : i32
    %c0_i32_0 = arith.constant 0 : i32
    %c0_i32_1 = arith.constant 0 : i32
    %c0_i32_2 = arith.constant 0 : i32
    return %arg0, %c0_i32, %c0_i32_0, %c0_i32_1 : i32, i32, i32, i32
  }
}

</mosaic_0001>

<bundles_post_ra>
// kernel: bottleneck_forward.1
= control target key start
LH: loop header
LB: loop body
LE: loop exit
PB: predicated region body
PF: predicated region fallthrough
CT: control target
= control target key end

     0   :  { %s4126_s24 = smov 0   ;;  %s5144_s0 = inlined_call_operand.vmem [shape: bf16[2,16,16,16], index: 0, kind: input, shape index: {}]   ;;  %s5145_s1 = inlined_call_operand.vmem [shape: bf16[16,128], index: 1, kind: input, shape index: {}]   ;;  %s5146_s2 = inlined_call_operand.vmem [shape: f32[1,128], index: 2, kind: input, shape index: {}]   ;;  %s5147_s3 = inlined_call_operand.vmem [shape: bf16[384,384], index: 3, kind: input, shape index: {}]   ;;  %s5148_s4 = inlined_call_operand.vmem [shape: f32[1,128], index: 4, kind: input, shape index: {}]   ;;  %s5149_s5 = inlined_call_operand.vmem [shape: bf16[128,16], index: 5, kind: input, shape index: {}]   ;;  %s5150_s6 = inlined_call_operand.vmem [shape: f32[1,16], index: 6, kind: input, shape index: {}]   ;;  %s5151_s7 = inlined_call_operand.vmem [shape: bf16[2,16,16,16], index: 7, kind: output, shape index: {}]  }
   0x1 LB: > { %s3351_s25 = sadd.s32 4294967295, %s4083_s24   ;;  %p3355_p0 = scmp.ge.s32.totalorder %s4083_s24, 1  ;;  %s4083_s24 = sphi %s4126_s24, %s17_s24  }
   0x2   : > { %p237_p1 = scmp.lt.s32.totalorder %s4083_s24, 3 }
   0x4   : > { %p238_p2 = pnand %p3355_p0, %p237_p1 }
   0x5   : > { %v3924_v0 = vld [vmem:[%s5145_s1] sm:$0xff] (!%p238_p2)   ;;  %p269_p3 = scmp.lt.s32.totalorder (!%p238_p2), %s3351_s25, 1  ;;  %v3944_v3 = vld [vmem:[%s5147_s3 + $0x1c] ss:$12 sps:$4 sm:$0xff] (!%p238_p2)   ;;  %vm407_vm0 = vcmask (!%p238_p2), 130048   ;;  %vm1885_vm1 = vcmask (!%p238_p2), 1040384  }
   0x6   : > { %241 = sbr.rel (%p238_p2) target bundleno = 939 (0x3ab), region = 48  ;;  %v3941_v1 = vld [vmem:[%s5147_s3 + $0x4] ss:$12 sps:$4 sm:$0xff] (!%p238_p2)   ;;  %3721 = vmatprep.subr.bf16.mxu0 (!%p238_p2), %v3924_v0  ;;  %v3943_v2 = vld [vmem:[%s5147_s3] ss:$12 sps:$4 sm:$0xff] (!%p238_p2)   ;;  %vm2014_vm3 = vcmask (!%p238_p2), 1046528  }
   0x7   : > { %3722 = vmatpush3.bf16.msra.mxu0 (!%p238_p2), %v3924_v0  ;;  %1145 = vmatprep.subr.bf16.mxu1 (!%p238_p2), %v3941_v1  ;;  %v3946_v4 = vld [vmem:[%s5147_s3 + $0x18] ss:$12 sps:$4 sm:$0xff] (!%p238_p2)   ;;  %v3947_v5 = vld [vmem:[%s5147_s3 + $0x34] ss:$12 sps:$4 sm:$0xff] (!%p238_p2)   ;;  %v3949_v9 = vld [vmem:[%s5147_s3 + $0x30] ss:$12 sps:$4 sm:$0xff] (!%p238_p2)  }
   0x8   : > { %1146 = vmatpush1.bf16.msra.mxu1 (!%p238_p2), %v3943_v2  ;;  %v3950_v10 = vld [vmem:[%s5147_s3 + $0x4c] ss:$12 sps:$4 sm:$0xff] (!%p238_p2)   ;;  %v3952_v13 = vld [vmem:[%s5147_s3 + $0x48] ss:$12 sps:$4 sm:$0xff] (!%p238_p2)   ;;  %v3953_v14 = vld [vmem:[%s5147_s3 + $0x64] ss:$12 sps:$4 sm:$0xff] (!%p238_p2)  }
   0x9   : > { %1147 = vmatprep.subr.bf16.mxu1 (!%p238_p2), %v3944_v3  ;;  %v3955_v15 = vld [vmem:[%s5147_s3 + $0x60] ss:$12 sps:$4 sm:$0xff] (!%p238_p2)   ;;  %v3956_v17 = vld [vmem:[%s5147_s3 + $0x7c] ss:$12 sps:$4 sm:$0xff] (!%p238_p2)   ;;  %v3958_v19 = vld [vmem:[%s5147_s3 + $0x78] ss:$12 sps:$4 sm:$0xff] (!%p238_p2)  }
   0xa   : > { %v3968_v20 = vld [vmem:[%s5147_s3 + $0xc8] ss:$12 sps:$4 sm:$0xff] (!%p238_p2)   ;;  %v3973_v23 = vld [vmem:[%s5147_s3 + $0xe0] ss:$12 sps:$4 sm:$0xff] (!%p238_p2)   ;;  %v3961_v25 = vld [vmem:[%s5147_s3 + $0x90] ss:$12 sps:$4 sm:$0xff] (!%p238_p2)  }
   0xb   : > { %v3969_v21 = vld [vmem:[%s5147_s3 + $0x8] ss:$12 sps:$4 sm:$0xff] (!%p238_p2)   ;;  %3561 = vmatprep.subr.bf16.mxu0 (!%p238_p2), %v3968_v20  ;;  %v3974_v24 = vld [vmem:[%s5147_s3 + $0x20] ss:$12 sps:$4 sm:$0xff] (!%p238_p2)   ;;  %v3978_v28 = vld [vmem:[%s5147_s3 + $0xf8] ss:$12 sps:$4 sm:$0xff] (!%p238_p2)  }
   0xc   : > { %1148 = vmatpush1.bf16.msra.mxu1 (!%p238_p2), %v3946_v4  ;;  %v3959_v22 = vld [vmem:[%s5147_s3 + $0x94] ss:$12 sps:$4 sm:$0xff] (!%p238_p2)   ;;  %v3962_v26 = vld [vmem:[%s5147_s3 + $0xac] ss:$12 sps:$4 sm:$0xff] (!%p238_p2)   ;;  %v3965_v32 = vld [vmem:[%s5147_s3 + $0xc4] ss:$12 sps:$4 sm:$0xff] (!%p238_p2)  }
   0xd   : > { %s5187_s25 = smov (!%p269_p3, %s3351_s25), 1  ;;  %1149 = vmatprep.subr.bf16.mxu1 %v3947_v5  ;;  %v3964_v30 = vld [vmem:[%s5147_s3 + $0xa8] ss:$12 sps:$4 sm:$0xff]   ;;  %v3979_v31 = vld [vmem:[%s5147_s3 + $0x38] ss:$12 sps:$4 sm:$0xff]  }
   0xe   : > { %s3510_s11 = sshll.u32 %s5187_s25, 7  ;;  %v3983_v33 = vld [vmem:[%s5147_s3 + $0x110] ss:$12 sps:$4 sm:$0xff]   ;;  %v3967_v34 = vld [vmem:[%s5147_s3 + $0xc0] ss:$12 sps:$4 sm:$0xff]  }
   0xf   : > { %s4157_s16 = scalar_lea.vmem %s5144_s0, %s3510_s11  ;;  %v3984_v35 = vld [vmem:[%s5147_s3 + $0x50] ss:$12 sps:$4 sm:$0xff]   ;;  %v3988_v36 = vld [vmem:[%s5147_s3 + $0x128] ss:$12 sps:$4 sm:$0xff]   ;;  %v3972_v40 = vld [vmem:[%s5147_s3 + $0xd8] ss:$12 sps:$4 sm:$0xff]   ;;  %s5033_s27 = scalar_lea.vmem %s5151_s7, %s3510_s11 }
  0x10   : > { %v280_v6 = vld [vmem:[%s4157_s16] sm:$0xff]   ;;  %v282_v7 = vld [vmem:[%s4157_s16 + $0x8] sm:$0xff]   ;;  %v284_v8 = vld [vmem:[%s4157_s16 + $0x10] sm:$0xff]   ;;  %1150 = vmatpush1.bf16.msra.mxu1 %v3949_v9 }
  0x11   : > { %3723 = vmatprep.mubr.msk.bf16.mxu0 %vm407_vm0, %v280_v6  ;;  %v286_v11 = vld [vmem:[%s4157_s16 + $0x18] sm:$0xff]   ;;  %v288_v12 = vld [vmem:[%s4157_s16 + $0x20] sm:$0xff]   ;;  %1151 = vmatprep.subr.bf16.mxu1 %v3950_v10  ;;  %v290_v16 = vld [vmem:[%s4157_s16 + $0x28] sm:$0xff]  }
  0x12   : > { %3724 = vmatmul.mubr.msk.bf16.vlgmr.msra.gmra.mrb[0].mxu0 %vm407_vm0, %v282_v7  ;;  %v292_v18 = vld [vmem:[%s4157_s16 + $0x30] sm:$0xff]   ;;  %v294_v27 = vld [vmem:[%s4157_s16 + $0x38] sm:$0xff]   ;;  %v296_v29 = vld [vmem:[%s4157_s16 + $0x40] sm:$0xff]  }
  0x13   : > { %3727 = vmatprep.mubr.msk.bf16.mxu0 %vm407_vm0, %v284_v8  ;;  %3562 = vmatpush3.bf16.msra.mxu0 %v3969_v21  ;;  %v298_v37 = vld [vmem:[%s4157_s16 + $0x48] sm:$0xff]   ;;  %v300_v39 = vld [vmem:[%s4157_s16 + $0x50] sm:$0xff]   ;;  %v302_v46 = vld [vmem:[%s4157_s16 + $0x58] sm:$0xff]  }
  0x14   : > { %1152 = vmatpush1.bf16.msra.mxu1 %v3952_v13  ;;  %3563 = vmatprep.subr.bf16.mxu0 %v3973_v23  ;;  %v3970_v38 = vld [vmem:[%s5147_s3 + $0xdc] ss:$12 sps:$4 sm:$0xff]   ;;  %v3975_v42 = vld [vmem:[%s5147_s3 + $0xf4] ss:$12 sps:$4 sm:$0xff]   ;;  %v3980_v45 = vld [vmem:[%s5147_s3 + $0x10c] ss:$12 sps:$4 sm:$0xff]  }
  0x15   : > { %1153 = vmatprep.subr.bf16.mxu1 %v3953_v14  ;;  %v3989_v41 = vld [vmem:[%s5147_s3 + $0x68] ss:$12 sps:$4 sm:$0xff]   ;;  %v3993_v43 = vld [vmem:[%s5147_s3 + $0x140] ss:$12 sps:$4 sm:$0xff]   ;;  %v3977_v44 = vld [vmem:[%s5147_s3 + $0xf0] ss:$12 sps:$4 sm:$0xff]  }
  0x16   : > { %v304_v47 = vld [vmem:[%s4157_s16 + $0x60] sm:$0xff]   ;;  %v3982_v48 = vld [vmem:[%s5147_s3 + $0x108] ss:$12 sps:$4 sm:$0xff]   ;;  %v310_v55 = vld [vmem:[%s4157_s16 + $0x78] sm:$0xff]  }
  0x17   : > { %3564 = vmatpush3.bf16.msra.mxu0 %v3974_v24  ;;  %v3985_v49 = vld [vmem:[%s5147_s3 + $0x124] ss:$12 sps:$4 sm:$0xff]   ;;  %v3987_v50 = vld [vmem:[%s5147_s3 + $0x120] ss:$12 sps:$4 sm:$0xff]   ;;  %v3990_v51 = vld [vmem:[%s5147_s3 + $0x13c] ss:$12 sps:$4 sm:$0xff]  }
  0x18   : > { %1154 = vmatpush1.bf16.msra.mxu1 %v3955_v15  ;;  %3565 = vmatprep.subr.bf16.mxu0 %v3978_v28  ;;  %v306_v52 = vld [vmem:[%s4157_s16 + $0x68] sm:$0xff]   ;;  %v308_v53 = vld [vmem:[%s4157_s16 + $0x70] sm:$0xff]   ;;  %v3992_v54 = vld [vmem:[%s5147_s3 + $0x138] ss:$12 sps:$4 sm:$0xff]  }
  0x19   : > { %1155 = vmatprep.subr.bf16.mxu1 %v3956_v17  ;;  %v3994_v56 = vld [vmem:[%s5147_s3 + $0x80] ss:$12 sps:$4 sm:$0xff]   ;;  %v3998_v58 = vld [vmem:[%s5147_s3 + $0x158] ss:$12 sps:$4 sm:$0xff]   ;;  %v3997_v59 = vld [vmem:[%s5147_s3 + $0x150] ss:$12 sps:$4 sm:$0xff]  }
  0x1a   : > { %3728 = vmatmul.mubr.msk.bf16.gmra.mrb[4].mxu0 %vm407_vm0, %v286_v11  ;;  %v3995_v57 = vld [vmem:[%s5147_s3 + $0x154] ss:$12 sps:$4 sm:$0xff]   ;;  %v3999_v60 = vld [vmem:[%s5147_s3 + $0x98] ss:$12 sps:$4 sm:$0xff]   ;;  %v4003_v62 = vld [vmem:[%s5147_s3 + $0x170] ss:$12 sps:$4 sm:$0xff]  }
  0x1b   : > { %3731 = vmatprep.mubr.msk.bf16.mxu0 %vm407_vm0, %v288_v12  ;;  %3566 = vmatpush3.bf16.msra.mxu0 %v3979_v31  ;;  %v4000_v61 = vld [vmem:[%s5147_s3 + $0x16c] ss:$12 sps:$4 sm:$0xff]   ;;  %v4002_v63 = vld [vmem:[%s5147_s3 + $0x168] ss:$12 sps:$4 sm:$0xff]   ;;  %v4004_v0 = vld [vmem:[%s5147_s3 + $0xb0] ss:$12 sps:$4 sm:$0xff]  }
  0x1c   : > { %1156 = vmatpush1.bf16.msra.mxu1 %v3958_v19  ;;  %3567 = vmatprep.subr.bf16.mxu0 %v3983_v33  ;;  %v4007_v1 = vld [vmem:[%s5147_s3 + $0x184] ss:$12 sps:$4 sm:$0xff]   ;;  %v4017_v2 = vld [vmem:[%s5147_s3 + $0x188] ss:$12 sps:$4 sm:$0xff]   ;;  %v4332_v3 = vld [vmem:[%s5146_s2] ss:$0 sm:$0xff] }
  0x1d   : > { %1157 = vmatprep.subr.bf16.mxu1 %v3959_v22  ;;  %v4010_v22 = vld [vmem:[%s5147_s3 + $0x19c] ss:$12 sps:$4 sm:$0xff]  }
  0x1f   : > { %3568 = vmatpush3.bf16.msra.mxu0 %v3984_v35 }
  0x20   : > { %1158 = vmatpush1.bf16.msra.mxu1 %v3961_v25  ;;  %3569 = vmatprep.subr.bf16.mxu0 %v3988_v36  ;;  %v4085_v25 = vmov 0  }
  0x21   : > { %1159 = vmatprep.subr.bf16.mxu1 %v3962_v26 }
  0x22   : > { %3732 = vmatmul.mubr.msk.bf16.gmra.mrb[8].mxu0 %vm407_vm0, %v290_v16 }
  0x23   : > { %3735 = vmatprep.mubr.msk.bf16.mxu0 %vm407_vm0, %v292_v18  ;;  %3570 = vmatpush3.bf16.msra.mxu0 %v3989_v41  ;;  %v4005_v18 = vld [vmem:[%s5147_s3 + $0x180] ss:$12 sps:$4 sm:$0xff]   ;;  %v4011_v41 = vld [vmem:[%s5147_s3 + $0x1b0] ss:$12 sps:$4 sm:$0xff]  }
  0x24   : > { %1160 = vmatpush1.bf16.msra.mxu1 %v3964_v30  ;;  %3571 = vmatprep.subr.bf16.mxu0 %v3993_v43 }
  0x25   : > { %1161 = vmatprep.subr.bf16.mxu1 %v3965_v32  ;;  %v4008_v32 = vld [vmem:[%s5147_s3 + $0x198] ss:$12 sps:$4 sm:$0xff]  }
  0x27   : > { %3572 = vmatpush3.bf16.msra.mxu0 %v3994_v56 }
  0x28   : > { %1162 = vmatpush1.bf16.msra.mxu1 %v3967_v34  ;;  %3573 = vmatprep.subr.bf16.mxu0 %v3998_v58  ;;  %v4013_v34 = vld [vmem:[%s5147_s3 + $0x1b4] ss:$12 sps:$4 sm:$0xff]  }
  0x29   : > { %1163 = vmatprep.subr.bf16.mxu1 %v3970_v38 }
  0x2a   : > { %3736 = vmatmul.mubr.msk.bf16.gmra.mrb[12].mxu0 %vm407_vm0, %v294_v27 }
  0x2b   : > { %3739 = vmatprep.mubr.msk.bf16.mxu0 %vm407_vm0, %v296_v29  ;;  %3574 = vmatpush3.bf16.msra.mxu0 %v3999_v60  ;;  %v4021_v29 = vld [vmem:[%s5147_s3 + $0x1a0] ss:$12 sps:$4 sm:$0xff]  }
  0x2c   : > { %1164 = vmatpush1.bf16.msra.mxu1 %v3972_v40  ;;  %3575 = vmatprep.subr.bf16.mxu0 %v4003_v62  ;;  %v4033_v62 = vld [vmem:[%s5147_s3 + $0x1e8] ss:$12 sps:$4 sm:$0xff]  }
  0x2d   : > { %1165 = vmatprep.subr.bf16.mxu1 %v3975_v42  ;;  %v4025_v42 = vld [vmem:[%s5147_s3 + $0x1b8] ss:$12 sps:$4 sm:$0xff]  }
  0x2f   : > { %3576 = vmatpush3.bf16.msra.mxu0 %v4004_v0 }
  0x30   : > { %1166 = vmatpush1.bf16.msra.mxu1 %v3977_v44  ;;  %3755 = vmatprep.subr.bf16.mxu0 %v4017_v2 }
  0x31   : > { %1167 = vmatprep.subr.bf16.mxu1 %v3980_v45  ;;  %v4016_v45 = vld [vmem:[%s5147_s3 + $0x1cc] ss:$12 sps:$4 sm:$0xff]  }
  0x32   : > { %3740 = vmatmul.mubr.msk.bf16.gmra.mrb[16].mxu0 %vm407_vm0, %v298_v37 }
  0x33   : > { %3743 = vmatprep.mubr.msk.bf16.mxu0 %vm407_vm0, %v300_v39 }
  0x34   : > { %1168 = vmatpush1.bf16.msra.mxu1 %v3982_v48 }
  0x35   : > { %1169 = vmatprep.subr.bf16.mxu1 %v3985_v49  ;;  %v4029_v49 = vld [vmem:[%s5147_s3 + $0x1d0] ss:$12 sps:$4 sm:$0xff]  }
  0x38   : > { %1170 = vmatpush1.bf16.msra.mxu1 %v3987_v50 }
  0x39   : > { %1171 = vmatprep.subr.bf16.mxu1 %v3990_v51 }
  0x3a   : > { %3744 = vmatmul.mubr.msk.bf16.gmra.mrb[20].mxu0 %vm407_vm0, %v302_v46 }
  0x3b   : > { %3747 = vmatprep.mubr.msk.bf16.mxu0 %vm407_vm0, %v304_v47 }
  0x3c   : > { %1172 = vmatpush1.bf16.msra.mxu1 %v3992_v54 }
  0x3d   : > { %1173 = vmatprep.subr.bf16.mxu1 %v3995_v57 }
  0x40   : > { %1174 = vmatpush1.bf16.msra.mxu1 %v3997_v59 }
  0x41   : > { %1175 = vmatprep.subr.bf16.mxu1 %v4000_v61  ;;  %v4018_v61 = vld [vmem:[%s5147_s3 + $0x1e0] ss:$12 sps:$4 sm:$0xff]  }
  0x42   : > { %3748 = vmatmul.mubr.msk.bf16.gmra.mrb[24].mxu0 %vm407_vm0, %v306_v52 }
  0x43   : > { %3751 = vmatprep.mubr.msk.bf16.mxu0 %vm407_vm0, %v308_v53  ;;  %v4014_v53 = vld [vmem:[%s5147_s3 + $0x1c8] ss:$12 sps:$4 sm:$0xff]  }
  0x44   : > { %1176 = vmatpush1.bf16.msra.mxu1 %v4002_v63 }
  0x45   : > { %1338 = vmatprep.subr.bf16.mxu1 %v4007_v1  ;;  %v4024_v1 = vld [vmem:[%s5147_s3 + $0x1fc] ss:$12 sps:$4 sm:$0xff]  }
  0x4a   : > { %3752 = vmatmul.mubr.msk.bf16.gmra.mrb[28].mxu0 %vm407_vm0, %v310_v55  ;;  %v4020_v55 = vld [vmem:[%s5147_s3 + $0x1e4] ss:$12 sps:$4 sm:$0xff]  }
  0xe5   : > { %v3725_v4 = vpop.f32.mrb[0].mxu0 }
  0xe6   : > { %v499_v5 = vadd.f32 %v3725_v4, %v4332_v3  ;;  %v490_v6 = vpop.f32.mrb[1].mxu0 }
  0xe7   : > { %v491_v7 = vadd.f32 %v4332_v3, %v490_v6  ;;  %v3726_v8 = vpop.f32.mrb[2].mxu0  ;;  %v4034_v6 = vld [vmem:[%s5147_s3 + $0x200] ss:$12 sps:$4 sm:$0xff]  }
  0xe8   : > { %v502_v9 = vadd.f32 %v3726_v8, %v4332_v3  ;;  %v493_v10 = vpop.f32.mrb[3].mxu0  ;;  %v619_v12 = vmax.f32 %v499_v5, 0.0 }
  0xe9   : > { %v494_v11 = vadd.f32 %v4332_v3, %v493_v10  ;;  %v617_v14 = vmax.f32 %v491_v7, 0.0  ;;  %v4022_v10 = vld [vmem:[%s5147_s3 + $0x1f8] ss:$12 sps:$4 sm:$0xff]  }
  0xea   : > { %v620_v13 = vmax.f32 %v502_v9, 0.0 }
  0xeb   : > { %v618_v15 = vmax.f32 %v494_v11, 0.0 }
  0xec   : > { %v4338_v16 = vpack.c.bf16 %v620_v13, %v619_v12  ;;  %v4028_v12 = vld [vmem:[%s5147_s3 + $0x214] ss:$12 sps:$4 sm:$0xff]  }
  0xed   : > { %v649_v17 = vpack.c.bf16 %v618_v15, %v617_v14  ;;  %v3729_v19 = vpop.f32.mrb[4].mxu0 }
  0xee   : > { %v515_v20 = vadd.f32 %v3729_v19, %v4332_v3  ;;  %v506_v21 = vpop.f32.mrb[5].mxu0  ;;  %v4026_v19 = vld [vmem:[%s5147_s3 + $0x210] ss:$12 sps:$4 sm:$0xff]  }
  0xef   : > { %1177 = vmatprep.mubr.bf16.mxu1 %v649_v17  ;;  %1563 = vmatprep.mubr.bf16.mxu0 %v649_v17  ;;  %v507_v23 = vadd.f32 %v4332_v3, %v506_v21  ;;  %v3730_v24 = vpop.f32.mrb[6].mxu0 }
  0xf0   : > { %1178 = vmatmul.mubr.bf16.vlgmr.msra.gmra.mrb[0].mxu1 %v4085_v25  ;;  %1564 = vmatmul.mubr.bf16.vlgmr.msra.gmra.mrb[32].mxu0 %v4085_v25  ;;  %v623_v26 = vmax.f32 %v515_v20, 0.0  ;;  %v518_v27 = vadd.f32 %v3730_v24, %v4332_v3  ;;  %v509_v28 = vpop.f32.mrb[7].mxu0  ;;  %v4035_v20 = vld [vmem:[%s5147_s3 + $0x218] ss:$12 sps:$4 sm:$0xff]  }
  0xf1   : > { %1339 = vmatpush1.bf16.msra.mxu1 %v4005_v18  ;;  %1187 = vmatprep.mubr.bf16.mxu1 %v4338_v16  ;;  %v621_v30 = vmax.f32 %v507_v23, 0.0  ;;  %v510_v31 = vadd.f32 %v4332_v3, %v509_v28  ;;  %v4032_v23 = vld [vmem:[%s5147_s3 + $0x22c] ss:$12 sps:$4 sm:$0xff]   ;;  %v4036_v28 = vld [vmem:[%s5147_s3 + $0x230] ss:$12 sps:$4 sm:$0xff]  }
  0xf2   : > { %1571 = vmatprep.mubr.bf16.mxu0 %v4338_v16  ;;  %v624_v33 = vmax.f32 %v518_v27, 0.0  ;;  %1340 = vmatprep.subr.bf16.mxu1 %v4010_v22 }
  0xf3   : > { %v622_v35 = vmax.f32 %v510_v31, 0.0  ;;  %3756 = vmatpush3.bf16.msra.mxu0 %v4017_v2 }
  0xf4   : > { %v4363_v36 = vpack.c.bf16 %v624_v33, %v623_v26  ;;  %3757 = vmatprep.subr.bf16.mxu0 %v4021_v29 }
  0xf5   : > { %v4365_v37 = vpack.c.bf16 %v622_v35, %v621_v30  ;;  %1341 = vmatpush1.bf16.msra.mxu1 %v4008_v32  ;;  %v3733_v38 = vpop.f32.mrb[8].mxu0  ;;  %v4030_v32 = vld [vmem:[%s5147_s3 + $0x228] ss:$12 sps:$4 sm:$0xff]  }
  0xf6   : > { %v531_v39 = vadd.f32 %v3733_v38, %v4332_v3  ;;  %v522_v40 = vpop.f32.mrb[9].mxu0  ;;  %1342 = vmatprep.subr.bf16.mxu1 %v4013_v34 }
  0xf7   : > { %v523_v43 = vadd.f32 %v4332_v3, %v522_v40  ;;  %v3734_v44 = vpop.f32.mrb[10].mxu0  ;;  %3758 = vmatpush3.bf16.msra.mxu0 %v4021_v29 }
  0xf8   : > { %1188 = vmatmul.mubr.bf16.gmra.mrb[4].mxu1 %v649_v17  ;;  %1572 = vmatmul.mubr.bf16.gmra.mrb[36].mxu0 %v649_v17  ;;  %v627_v46 = vmax.f32 %v531_v39, 0.0  ;;  %v534_v47 = vadd.f32 %v3734_v44, %v4332_v3  ;;  %v525_v48 = vpop.f32.mrb[11].mxu0 }
  0xf9   : > { %1197 = vmatprep.mubr.bf16.mxu1 %v4365_v37  ;;  %1579 = vmatprep.mubr.bf16.mxu0 %v4365_v37  ;;  %v625_v50 = vmax.f32 %v523_v43, 0.0  ;;  %v526_v51 = vadd.f32 %v4332_v3, %v525_v48 }
  0xfa   : > { %v628_v52 = vmax.f32 %v534_v47, 0.0  ;;  %1343 = vmatpush1.bf16.msra.mxu1 %v4011_v41  ;;  %3759 = vmatprep.subr.bf16.mxu0 %v4025_v42 }
  0xfb   : > { %v626_v54 = vmax.f32 %v526_v51, 0.0  ;;  %1344 = vmatprep.subr.bf16.mxu1 %v4016_v45  ;;  %3760 = vmatpush3.bf16.msra.mxu0 %v4025_v42 }
  0xfc   : > { %v4391_v56 = vpack.c.bf16 %v628_v52, %v627_v46  ;;  %3761 = vmatprep.subr.bf16.mxu0 %v4029_v49 }
  0xfd   : > { %v4393_v57 = vpack.c.bf16 %v626_v54, %v625_v50  ;;  %v3737_v58 = vpop.f32.mrb[12].mxu0 }
  0xfe   : > { %v547_v59 = vadd.f32 %v3737_v58, %v4332_v3  ;;  %v538_v60 = vpop.f32.mrb[13].mxu0  ;;  %1345 = vmatpush1.bf16.msra.mxu1 %v4014_v53 }
  0xff   : > { %v539_v63 = vadd.f32 %v4332_v3, %v538_v60  ;;  %v3738_v0 = vpop.f32.mrb[14].mxu0  ;;  %1346 = vmatprep.subr.bf16.mxu1 %v4020_v55  ;;  %3762 = vmatpush3.bf16.msra.mxu0 %v4029_v49 }
 0x100   : > { %1198 = vmatmul.mubr.bf16.gmra.mrb[8].mxu1 %v4338_v16  ;;  %1580 = vmatmul.mubr.bf16.gmra.mrb[40].mxu0 %v4338_v16  ;;  %v631_v2 = vmax.f32 %v547_v59, 0.0  ;;  %v550_v4 = vadd.f32 %v3738_v0, %v4332_v3  ;;  %v541_v5 = vpop.f32.mrb[15].mxu0 }
 0x101   : > { %1207 = vmatprep.mubr.bf16.mxu1 %v4363_v36  ;;  %1587 = vmatprep.mubr.bf16.mxu0 %v4363_v36  ;;  %v629_v7 = vmax.f32 %v539_v63, 0.0  ;;  %v542_v8 = vadd.f32 %v4332_v3, %v541_v5 }
 0x102   : > { %v632_v9 = vmax.f32 %v550_v4, 0.0  ;;  %1347 = vmatpush1.bf16.msra.mxu1 %v4018_v61  ;;  %3763 = vmatprep.subr.bf16.mxu0 %v4033_v62 }
 0x103   : > { %v630_v11 = vmax.f32 %v542_v8, 0.0  ;;  %1348 = vmatprep.subr.bf16.mxu1 %v4024_v1  ;;  %3764 = vmatpush3.bf16.msra.mxu0 %v4033_v62 }
 0x104   : > { %v4421_v13 = vpack.c.bf16 %v632_v9, %v631_v2  ;;  %3765 = vmatprep.subr.bf16.mxu0 %v4034_v6 }
 0x105   : > { %v4423_v14 = vpack.c.bf16 %v630_v11, %v629_v7  ;;  %v3741_v15 = vpop.f32.mrb[16].mxu0 }
 0x106   : > { %v563_v17 = vadd.f32 %v3741_v15, %v4332_v3  ;;  %v554_v18 = vpop.f32.mrb[17].mxu0  ;;  %1349 = vmatpush1.bf16.msra.mxu1 %v4022_v10 }
 0x107   : > { %v555_v21 = vadd.f32 %v4332_v3, %v554_v18  ;;  %v3742_v22 = vpop.f32.mrb[18].mxu0  ;;  %1350 = vmatprep.subr.bf16.mxu1 %v4028_v12  ;;  %3766 = vmatpush3.bf16.msra.mxu0 %v4034_v6 }
 0x108   : > { %1208 = vmatmul.mubr.bf16.gmra.mrb[12].mxu1 %v4365_v37  ;;  %1588 = vmatmul.mubr.bf16.gmra.mrb[44].mxu0 %v4365_v37  ;;  %v635_v24 = vmax.f32 %v563_v17, 0.0  ;;  %v566_v26 = vadd.f32 %v3742_v22, %v4332_v3  ;;  %v557_v27 = vpop.f32.mrb[19].mxu0  ;;  %v4040_v22 = vld [vmem:[%s5149_s5 + $0x18] sm:$0xff]  }
 0x109   : > { %1217 = vmatprep.mubr.bf16.mxu1 %v4393_v57  ;;  %1595 = vmatprep.mubr.bf16.mxu0 %v4393_v57  ;;  %v633_v29 = vmax.f32 %v555_v21, 0.0  ;;  %v558_v30 = vadd.f32 %v4332_v3, %v557_v27 }
 0x10a   : > { %v636_v31 = vmax.f32 %v566_v26, 0.0  ;;  %1351 = vmatpush1.bf16.msra.mxu1 %v4026_v19  ;;  %3767 = vmatprep.subr.bf16.mxu0 %v4035_v20 }
 0x10b   : > { %v634_v33 = vmax.f32 %v558_v30, 0.0  ;;  %1352 = vmatprep.subr.bf16.mxu1 %v4032_v23  ;;  %3768 = vmatpush3.bf16.msra.mxu0 %v4035_v20 }
 0x10c   : > { %v4448_v34 = vpack.c.bf16 %v636_v31, %v635_v24  ;;  %3769 = vmatprep.subr.bf16.mxu0 %v4036_v28  ;;  %v4041_v24 = vld [vmem:[%s5149_s5 + $0x20] sm:$0xff]   ;;  %v4042_v31 = vld [vmem:[%s5149_s5 + $0x28] sm:$0xff]  }
 0x10d   : > { %v4450_v35 = vpack.c.bf16 %v634_v33, %v633_v29  ;;  %v3745_v38 = vpop.f32.mrb[20].mxu0  ;;  %v4043_v33 = vld [vmem:[%s5149_s5 + $0x30] sm:$0xff]  }
 0x10e   : > { %v579_v39 = vadd.f32 %v3745_v38, %v4332_v3  ;;  %v570_v40 = vpop.f32.mrb[21].mxu0  ;;  %1353 = vmatpush1.bf16.msra.mxu1 %v4030_v32 }
 0x10f   : > { %v571_v41 = vadd.f32 %v4332_v3, %v570_v40  ;;  %v3746_v42 = vpop.f32.mrb[22].mxu0  ;;  %3770 = vmatpush3.bf16.msra.mxu0 %v4036_v28 }
 0x110   : > { %1218 = vmatmul.mubr.bf16.gmra.mrb[16].mxu1 %v4363_v36  ;;  %1596 = vmatmul.mubr.bf16.gmra.mrb[48].mxu0 %v4363_v36  ;;  %v639_v43 = vmax.f32 %v579_v39, 0.0  ;;  %v582_v44 = vadd.f32 %v3746_v42, %v4332_v3  ;;  %v573_v45 = vpop.f32.mrb[23].mxu0 }
 0x111   : > { %1227 = vmatprep.mubr.bf16.mxu1 %v4391_v56  ;;  %1603 = vmatprep.mubr.bf16.mxu0 %v4391_v56  ;;  %v637_v46 = vmax.f32 %v571_v41, 0.0  ;;  %v574_v47 = vadd.f32 %v4332_v3, %v573_v45  ;;  %v4044_v41 = vld [vmem:[%s5149_s5 + $0x38] sm:$0xff]  }
 0x112   : > { %v640_v48 = vmax.f32 %v582_v44, 0.0 }
 0x113   : > { %v638_v49 = vmax.f32 %v574_v47, 0.0 }
 0x114   : > { %v4460_v50 = vpack.c.bf16 %v640_v48, %v639_v43 }
 0x115   : > { %v4462_v51 = vpack.c.bf16 %v638_v49, %v637_v46  ;;  %v3749_v52 = vpop.f32.mrb[24].mxu0 }
 0x116   : > { %v595_v53 = vadd.f32 %v3749_v52, %v4332_v3  ;;  %v586_v54 = vpop.f32.mrb[25].mxu0 }
 0x117   : > { %v587_v55 = vadd.f32 %v4332_v3, %v586_v54  ;;  %v3750_v58 = vpop.f32.mrb[26].mxu0 }
 0x118   : > { %1228 = vmatmul.mubr.bf16.gmra.mrb[20].mxu1 %v4393_v57  ;;  %1604 = vmatmul.mubr.bf16.gmra.mrb[52].mxu0 %v4393_v57  ;;  %v643_v59 = vmax.f32 %v595_v53, 0.0  ;;  %v598_v60 = vadd.f32 %v3750_v58, %v4332_v3  ;;  %v589_v61 = vpop.f32.mrb[27].mxu0 }
 0x119   : > { %1237 = vmatprep.mubr.bf16.mxu1 %v4423_v14  ;;  %1611 = vmatprep.mubr.bf16.mxu0 %v4423_v14  ;;  %v641_v62 = vmax.f32 %v587_v55, 0.0  ;;  %v590_v63 = vadd.f32 %v4332_v3, %v589_v61 }
 0x11a   : > { %v644_v0 = vmax.f32 %v598_v60, 0.0 }
 0x11b   : > { %v642_v1 = vmax.f32 %v590_v63, 0.0 }
 0x11c   : > { %v4472_v2 = vpack.c.bf16 %v644_v0, %v643_v59 }
 0x11d   : > { %v4474_v4 = vpack.c.bf16 %v642_v1, %v641_v62  ;;  %v3753_v5 = vpop.f32.mrb[28].mxu0 }
 0x11e   : > { %v611_v6 = vadd.f32 %v3753_v5, %v4332_v3  ;;  %v602_v7 = vpop.f32.mrb[29].mxu0 }
 0x11f   : > { %v603_v8 = vadd.f32 %v4332_v3, %v602_v7  ;;  %v3754_v9 = vpop.f32.mrb[30].mxu0 }
 0x120   : > { %1238 = vmatmul.mubr.bf16.gmra.mrb[24].mxu1 %v4391_v56  ;;  %1612 = vmatmul.mubr.bf16.gmra.mrb[56].mxu0 %v4391_v56  ;;  %v647_v10 = vmax.f32 %v611_v6, 0.0  ;;  %v614_v11 = vadd.f32 %v3754_v9, %v4332_v3  ;;  %v605_v12 = vpop.f32.mrb[31].mxu0 }
 0x121   : > { %1247 = vmatprep.mubr.bf16.mxu1 %v4421_v13  ;;  %1619 = vmatprep.mubr.bf16.mxu0 %v4421_v13  ;;  %v645_v15 = vmax.f32 %v603_v8, 0.0  ;;  %v606_v17 = vadd.f32 %v4332_v3, %v605_v12  ;;  %v4037_v3 = vld [vmem:[%s5149_s5] sm:$0xff]  }
 0x122   : > { %v648_v18 = vmax.f32 %v614_v11, 0.0  ;;  %3803 = vmatprep.subr.bf16.mxu0 %v4037_v3 }
 0x123   : > { %v646_v19 = vmax.f32 %v606_v17, 0.0 }
 0x124   : > { %v4484_v20 = vpack.c.bf16 %v648_v18, %v647_v10 }
 0x125   : > { %v4486_v21 = vpack.c.bf16 %v646_v19, %v645_v15 }
 0x128   : > { %1248 = vmatmul.mubr.bf16.gmra.mrb[28].mxu1 %v4423_v14  ;;  %1620 = vmatmul.mubr.bf16.gmra.mrb[60].mxu0 %v4423_v14 }
 0x129   : > { %1257 = vmatprep.mubr.bf16.mxu1 %v4450_v35  ;;  %1627 = vmatprep.mubr.bf16.mxu0 %v4450_v35 }
 0x130   : > { %1258 = vmatmul.mubr.bf16.gmra.mrb[32].mxu1 %v4421_v13  ;;  %1628 = vmatmul.mubr.bf16.gmra.mrb[64].mxu0 %v4421_v13 }
 0x131   : > { %1267 = vmatprep.mubr.bf16.mxu1 %v4448_v34  ;;  %1635 = vmatprep.mubr.bf16.mxu0 %v4448_v34 }
 0x138   : > { %1268 = vmatmul.mubr.bf16.gmra.mrb[36].mxu1 %v4450_v35  ;;  %1636 = vmatmul.mubr.bf16.gmra.mrb[68].mxu0 %v4450_v35 }
 0x139   : > { %1277 = vmatprep.mubr.bf16.mxu1 %v4462_v51  ;;  %1643 = vmatprep.mubr.bf16.mxu0 %v4462_v51 }
 0x140   : > { %1278 = vmatmul.mubr.bf16.gmra.mrb[40].mxu1 %v4448_v34  ;;  %1644 = vmatmul.mubr.bf16.gmra.mrb[72].mxu0 %v4448_v34 }
 0x141   : > { %1287 = vmatprep.mubr.bf16.mxu1 %v4460_v50  ;;  %1651 = vmatprep.mubr.bf16.mxu0 %v4460_v50 }
 0x148   : > { %1288 = vmatmul.mubr.bf16.gmra.mrb[44].mxu1 %v4462_v51  ;;  %1652 = vmatmul.mubr.bf16.gmra.mrb[76].mxu0 %v4462_v51 }
 0x149   : > { %1297 = vmatprep.mubr.bf16.mxu1 %v4474_v4  ;;  %1659 = vmatprep.mubr.bf16.mxu0 %v4474_v4 }
 0x150   : > { %1298 = vmatmul.mubr.bf16.gmra.mrb[48].mxu1 %v4460_v50  ;;  %1660 = vmatmul.mubr.bf16.gmra.mrb[80].mxu0 %v4460_v50 }
 0x151   : > { %1307 = vmatprep.mubr.bf16.mxu1 %v4472_v2  ;;  %1667 = vmatprep.mubr.bf16.mxu0 %v4472_v2 }
 0x158   : > { %1308 = vmatmul.mubr.bf16.gmra.mrb[52].mxu1 %v4474_v4  ;;  %1668 = vmatmul.mubr.bf16.gmra.mrb[84].mxu0 %v4474_v4 }
 0x159   : > { %1317 = vmatprep.mubr.bf16.mxu1 %v4486_v21  ;;  %1675 = vmatprep.mubr.bf16.mxu0 %v4486_v21 }
 0x160   : > { %1318 = vmatmul.mubr.bf16.gmra.mrb[56].mxu1 %v4472_v2  ;;  %1676 = vmatmul.mubr.bf16.gmra.mrb[88].mxu0 %v4472_v2 }
 0x161   : > { %1327 = vmatprep.mubr.bf16.mxu1 %v4484_v20  ;;  %1683 = vmatprep.mubr.bf16.mxu0 %v4484_v20 }
 0x168   : > { %1328 = vmatmul.mubr.bf16.gmra.mrb[60].mxu1 %v4486_v21  ;;  %1684 = vmatmul.mubr.bf16.gmra.mrb[92].mxu0 %v4486_v21 }
 0x169   : > { %3771 = vmatprep.mubr.bf16.mxu0 %v4338_v16  ;;  %1370 = vmatprep.mubr.bf16.mxu1 %v4085_v25 }
 0x170   : > { %1371 = vmatmul.mubr.bf16.vlgmr.msra.gmra.mrb[0].mxu1 %v4338_v16  ;;  %3772 = vmatmul.mubr.bf16.vlgmr.msra.gmra.mrb[96].mxu0 %v4365_v37  ;;  %v4038_v16 = vld [vmem:[%s5149_s5 + $0x8] sm:$0xff]  }
 0x171   : > { %3775 = vmatprep.mubr.bf16.mxu0 %v4363_v36  ;;  %1380 = vmatprep.mubr.bf16.mxu1 %v4085_v25 }
 0x172   : > { %3804 = vmatpush3.bf16.msra.mxu0 %v4037_v3 }
 0x173   : > { %3805 = vmatprep.subr.bf16.mxu0 %v4038_v16 }
 0x176   : > { %3806 = vmatpush3.bf16.msra.mxu0 %v4038_v16 }
 0x178   : > { %1381 = vmatmul.mubr.bf16.gmra.mrb[4].mxu1 %v4365_v37  ;;  %3776 = vmatmul.mubr.bf16.gmra.mrb[100].mxu0 %v4393_v57 }
 0x179   : > { %3779 = vmatprep.mubr.bf16.mxu0 %v4391_v56  ;;  %1390 = vmatprep.mubr.bf16.mxu1 %v4085_v25 }
 0x180   : > { %1391 = vmatmul.mubr.bf16.gmra.mrb[8].mxu1 %v4363_v36  ;;  %3780 = vmatmul.mubr.bf16.gmra.mrb[104].mxu0 %v4423_v14  ;;  %v4039_v36 = vld [vmem:[%s5149_s5 + $0x10] sm:$0xff]  }
 0x181   : > { %3783 = vmatprep.mubr.bf16.mxu0 %v4421_v13  ;;  %1400 = vmatprep.mubr.bf16.mxu1 %v4085_v25 }
 0x182   : > { %3807 = vmatprep.subr.bf16.mxu0 %v4039_v36 }
 0x183   : > { %3808 = vmatpush3.bf16.msra.mxu0 %v4039_v36 }
 0x184   : > { %3809 = vmatprep.subr.bf16.mxu0 %v4040_v22 }
 0x187   : > { %3810 = vmatpush3.bf16.msra.mxu0 %v4040_v22 }
 0x188   : > { %1401 = vmatmul.mubr.bf16.gmra.mrb[12].mxu1 %v4393_v57  ;;  %3784 = vmatmul.mubr.bf16.gmra.mrb[108].mxu0 %v4450_v35 }
 0x189   : > { %3787 = vmatprep.mubr.bf16.mxu0 %v4448_v34  ;;  %1410 = vmatprep.mubr.bf16.mxu1 %v4085_v25 }
 0x18a   : > { %3811 = vmatprep.subr.bf16.mxu0 %v4041_v24 }
 0x18b   : > { %3812 = vmatpush3.bf16.msra.mxu0 %v4041_v24 }
 0x18c   : > { %3813 = vmatprep.subr.bf16.mxu0 %v4042_v31 }
 0x18f   : > { %3814 = vmatpush3.bf16.msra.mxu0 %v4042_v31 }
 0x190   : > { %1411 = vmatmul.mubr.bf16.gmra.mrb[16].mxu1 %v4391_v56  ;;  %3788 = vmatmul.mubr.bf16.gmra.mrb[112].mxu0 %v4462_v51 }
 0x191   : > { %3791 = vmatprep.mubr.bf16.mxu0 %v4460_v50  ;;  %1420 = vmatprep.mubr.bf16.mxu1 %v4085_v25 }
 0x192   : > { %3815 = vmatprep.subr.bf16.mxu0 %v4043_v33 }
 0x193   : > { %3816 = vmatpush3.bf16.msra.mxu0 %v4043_v33 }
 0x194   : > { %3817 = vmatprep.subr.bf16.mxu0 %v4044_v41 }
 0x197   : > { %3818 = vmatpush3.bf16.msra.mxu0 %v4044_v41 }
 0x198   : > { %1421 = vmatmul.mubr.bf16.gmra.mrb[20].mxu1 %v4423_v14  ;;  %3792 = vmatmul.mubr.bf16.gmra.mrb[116].mxu0 %v4474_v4 }
 0x199   : > { %3795 = vmatprep.mubr.bf16.mxu0 %v4472_v2  ;;  %1430 = vmatprep.mubr.bf16.mxu1 %v4085_v25 }
 0x1a0   : > { %1431 = vmatmul.mubr.bf16.gmra.mrb[24].mxu1 %v4421_v13  ;;  %3796 = vmatmul.mubr.bf16.gmra.mrb[120].mxu0 %v4486_v21 }
 0x1a1   : > { %3799 = vmatprep.mubr.bf16.mxu0 %v4484_v20  ;;  %1440 = vmatprep.mubr.bf16.mxu1 %v4085_v25 }
 0x1a8   : > { %1441 = vmatmul.mubr.bf16.gmra.mrb[28].mxu1 %v4450_v35  ;;  %3800 = vmatmul.mubr.bf16.gmra.mrb[124].mxu0 %v4085_v25 }
 0x1a9   : > { %1450 = vmatprep.mubr.bf16.mxu1 %v4085_v25 }
 0x1b0   : > { %1451 = vmatmul.mubr.bf16.gmra.mrb[32].mxu1 %v4448_v34 }
 0x1b1   : > { %1460 = vmatprep.mubr.bf16.mxu1 %v4085_v25 }
 0x1b8   : > { %1461 = vmatmul.mubr.bf16.gmra.mrb[36].mxu1 %v4462_v51 }
 0x1b9   : > { %1470 = vmatprep.mubr.bf16.mxu1 %v4085_v25 }
 0x1c0   : > { %1471 = vmatmul.mubr.bf16.gmra.mrb[40].mxu1 %v4460_v50 }
 0x1c1   : > { %1480 = vmatprep.mubr.bf16.mxu1 %v4085_v25 }
 0x1c3   : > { %v3577_v37 = vpop.f32.mrb[32].mxu0 }
 0x1c4   : > { %v3578_v56 = vpop.f32.mrb[33].mxu0 }
 0x1c5   : > { %v4570_v57 = vadd.f32 %v3578_v56, %v3577_v37  ;;  %v3580_v13 = vpop.f32.mrb[34].mxu0 }
 0x1c6   : > { %v3581_v14 = vpop.f32.mrb[35].mxu0 }
 0x1c7   : > { %v4575_v23 = vadd.f32 %v3581_v14, %v3580_v13 }
 0x1c8   : > { %1481 = vmatmul.mubr.bf16.gmra.mrb[44].mxu1 %v4474_v4 }
 0x1c9   : > { %1490 = vmatprep.mubr.bf16.mxu1 %v4085_v25 }
 0x1cb   : > { %v3583_v26 = vpop.f32.mrb[36].mxu0 }
 0x1cc   : > { %v3584_v27 = vpop.f32.mrb[37].mxu0 }
 0x1cd   : > { %v4582_v28 = vadd.f32 %v3584_v27, %v3583_v26  ;;  %v3586_v29 = vpop.f32.mrb[38].mxu0 }
 0x1ce   : > { %v3587_v30 = vpop.f32.mrb[39].mxu0 }
 0x1cf   : > { %v4587_v32 = vadd.f32 %v3587_v30, %v3586_v29 }
 0x1d0   : > { %1491 = vmatmul.mubr.bf16.gmra.mrb[48].mxu1 %v4472_v2 }
 0x1d1   : > { %1500 = vmatprep.mubr.bf16.mxu1 %v4085_v25 }
 0x1d3   : > { %v3589_v34 = vpop.f32.mrb[40].mxu0 }
 0x1d4   : > { %v3590_v35 = vpop.f32.mrb[41].mxu0 }
 0x1d5   : > { %v4594_v38 = vadd.f32 %v3590_v35, %v3589_v34  ;;  %v3592_v39 = vpop.f32.mrb[42].mxu0 }
 0x1d6   : > { %v3593_v40 = vpop.f32.mrb[43].mxu0 }
 0x1d7   : > { %v4599_v42 = vadd.f32 %v3593_v40, %v3592_v39 }
 0x1d8   : > { %1501 = vmatmul.mubr.bf16.gmra.mrb[52].mxu1 %v4486_v21 }
 0x1d9   : > { %1510 = vmatprep.mubr.bf16.mxu1 %v4085_v25 }
 0x1db   : > { %v3595_v43 = vpop.f32.mrb[44].mxu0 }
 0x1dc   : > { %v3596_v44 = vpop.f32.mrb[45].mxu0 }
 0x1dd   : > { %v4603_v45 = vadd.f32 %v3596_v44, %v3595_v43  ;;  %v3598_v46 = vpop.f32.mrb[46].mxu0 }
 0x1de   : > { %v3599_v47 = vpop.f32.mrb[47].mxu0 }
 0x1df   : > { %v4605_v48 = vadd.f32 %v3599_v47, %v3598_v46 }
 0x1e0   : > { %1511 = vmatmul.mubr.bf16.gmra.mrb[56].mxu1 %v4484_v20 }
 0x1e1   : > { %1520 = vmatprep.mubr.bf16.mxu1 %v4085_v25 }
 0x1e3   : > { %v3601_v49 = vpop.f32.mrb[48].mxu0 }
 0x1e4   : > { %v3602_v50 = vpop.f32.mrb[49].mxu0 }
 0x1e5   : > { %v4609_v51 = vadd.f32 %v3602_v50, %v3601_v49  ;;  %v3604_v52 = vpop.f32.mrb[50].mxu0 }
 0x1e6   : > { %v3605_v53 = vpop.f32.mrb[51].mxu0 }
 0x1e7   : > { %v4611_v54 = vadd.f32 %v3605_v53, %v3604_v52 }
 0x1e8   : > { %1521 = vmatmul.mubr.bf16.gmra.mrb[60].mxu1 %v4085_v25 }
 0x1eb   : > { %v3607_v55 = vpop.f32.mrb[52].mxu0 }
 0x1ec   : > { %v3608_v58 = vpop.f32.mrb[53].mxu0 }
 0x1ed   : > { %v4614_v59 = vadd.f32 %v3608_v58, %v3607_v55  ;;  %v3610_v60 = vpop.f32.mrb[54].mxu0 }
 0x1ee   : > { %v3611_v61 = vpop.f32.mrb[55].mxu0 }
 0x1ef   : > { %v4616_v62 = vadd.f32 %v3611_v61, %v3610_v60 }
 0x1f3   : > { %v3613_v63 = vpop.f32.mrb[56].mxu0 }
 0x1f4   : > { %v3614_v0 = vpop.f32.mrb[57].mxu0 }
 0x1f5   : > { %v4618_v1 = vadd.f32 %v3614_v0, %v3613_v63  ;;  %v3616_v2 = vpop.f32.mrb[58].mxu0 }
 0x1f6   : > { %v3617_v4 = vpop.f32.mrb[59].mxu0 }
 0x1f7   : > { %v4620_v5 = vadd.f32 %v3617_v4, %v3616_v2  ;;  %v2111_v2 = vlaneseq }
 0x1fb   : > { %v3619_v6 = vpop.f32.mrb[60].mxu0 }
 0x1fc   : > { %v3620_v7 = vpop.f32.mrb[61].mxu0 }
 0x1fd   : > { %v4622_v8 = vadd.f32 %v3620_v7, %v3619_v6  ;;  %v3622_v25 = vpop.f32.mrb[62].mxu0  ;;  %v4654_v7 = vshrl.u32 %v2111_v2, 7 }
 0x1fe   : > { %v3623_v9 = vpop.f32.mrb[63].mxu0 }
 0x1ff   : > { %v4624_v10 = vadd.f32 %v3623_v9, %v3622_v25 }
 0x203   : > { %v3625_v11 = vpop.f32.mrb[64].mxu0 }
 0x204   : > { %v3626_v12 = vpop.f32.mrb[65].mxu0 }
 0x205   : > { %v4626_v15 = vadd.f32 %v3626_v12, %v3625_v11  ;;  %v3628_v17 = vpop.f32.mrb[66].mxu0 }
 0x206   : > { %v3629_v18 = vpop.f32.mrb[67].mxu0 }
 0x207   : > { %v4628_v19 = vadd.f32 %v3629_v18, %v3628_v17  ;;  %v2113_v17 = vadd.s32 8, %v4654_v7  ;;  %v2148_v18 = vand.u32 15, %v4654_v7 }
 0x209   : > { %vm4665_vm2 = vcmp.eq.s32.totalorder %v2148_v18, 0 }
 0x20b   : > { %v3631_v20 = vpop.f32.mrb[68].mxu0 }
 0x20c   : > { %v3632_v21 = vpop.f32.mrb[69].mxu0 }
 0x20d   : > { %v4630_v3 = vadd.f32 %v3632_v21, %v3631_v20  ;;  %v3634_v16 = vpop.f32.mrb[70].mxu0  ;;  %v2114_v20 = vadd.s32 16, %v4654_v7  ;;  %v2115_v21 = vadd.s32 24, %v4654_v7 }
 0x20e   : > { %v3635_v36 = vpop.f32.mrb[71].mxu0 }
 0x20f   : > { %v4632_v37 = vadd.f32 %v3635_v36, %v3634_v16 }
 0x213   : > { %v3637_v56 = vpop.f32.mrb[72].mxu0 }
 0x214   : > { %v3638_v13 = vpop.f32.mrb[73].mxu0 }
 0x215   : > { %v4634_v14 = vadd.f32 %v3638_v13, %v3637_v56  ;;  %v3640_v22 = vpop.f32.mrb[74].mxu0  ;;  %v2155_v56 = vand.u32 15, %v2113_v17 }
 0x216   : > { %v3641_v24 = vpop.f32.mrb[75].mxu0 }
 0x217   : > { %v4636_v26 = vadd.f32 %v3641_v24, %v3640_v22  ;;  %vm4676_vm4 = vcmp.eq.s32.totalorder %v2155_v56, 15 }
 0x21b   : > { %v3643_v27 = vpop.f32.mrb[76].mxu0 }
 0x21c   : > { %v3644_v29 = vpop.f32.mrb[77].mxu0 }
 0x21d   : > { %v4638_v30 = vadd.f32 %v3644_v29, %v3643_v27  ;;  %v3646_v31 = vpop.f32.mrb[78].mxu0 }
 0x21e   : > { %v3647_v33 = vpop.f32.mrb[79].mxu0 }
 0x21f   : > { %v4640_v34 = vadd.f32 %v3647_v33, %v3646_v31 }
 0x223   : > { %v3649_v35 = vpop.f32.mrb[80].mxu0 }
 0x224   : > { %v3650_v39 = vpop.f32.mrb[81].mxu0 }
 0x225   : > { %v4642_v40 = vadd.f32 %v3650_v39, %v3649_v35  ;;  %v3652_v41 = vpop.f32.mrb[82].mxu0  ;;  %v2162_v39 = vand.u32 15, %v2114_v20 }
 0x226   : > { %v3653_v43 = vpop.f32.mrb[83].mxu0 }
 0x227   : > { %v4644_v44 = vadd.f32 %v3653_v43, %v3652_v41  ;;  %v2116_v41 = vadd.s32 32, %v4654_v7  ;;  %vm4685_vm5 = vcmp.eq.s32.totalorder %v2162_v39, 0 }
 0x229   : > { %v2176_v17 = vand.u32 15, %v2116_v41 }
 0x22b   : > { %v3655_v46 = vpop.f32.mrb[84].mxu0  ;;  %vm4708_vm7 = vcmp.eq.s32.totalorder %v2176_v17, 0 }
 0x22c   : > { %v3656_v47 = vpop.f32.mrb[85].mxu0 }
 0x22d   : > { %v4646_v49 = vadd.f32 %v3656_v47, %v3655_v46  ;;  %v3658_v50 = vpop.f32.mrb[86].mxu0 }
 0x22e   : > { %v3659_v52 = vpop.f32.mrb[87].mxu0 }
 0x22f   : > { %v4648_v53 = vadd.f32 %v3659_v52, %v3658_v50  ;;  %v2169_v52 = vand.u32 15, %v2115_v21 }
 0x231   : > { %vm4689_vm6 = vcmp.eq.s32.totalorder %v2169_v52, 15  ;;  %v4713_v52 = vadd.s32 48, %v4654_v7 }
 0x233   : > { %v3661_v55 = vpop.f32.mrb[88].mxu0 }
 0x234   : > { %v3662_v58 = vpop.f32.mrb[89].mxu0 }
 0x235   : > { %v4650_v60 = vadd.f32 %v3662_v58, %v3661_v55  ;;  %v3664_v61 = vpop.f32.mrb[90].mxu0 }
 0x236   : > { %v3665_v63 = vpop.f32.mrb[91].mxu0 }
 0x237   : > { %v4652_v0 = vadd.f32 %v3665_v63, %v3664_v61  ;;  %v4681_v61 = vadd.s32 40, %v4654_v7 }
 0x23b   : > { %v3667_v4 = vpop.f32.mrb[92].mxu0 }
 0x23c   : > { %v3668_v6 = vpop.f32.mrb[93].mxu0 }
 0x23d   : > { %v4656_v25 = vadd.f32 %v3668_v6, %v3667_v4  ;;  %v3670_v9 = vpop.f32.mrb[94].mxu0 }
 0x23e   : > { %v3671_v11 = vpop.f32.mrb[95].mxu0 }
 0x23f   : > { %v4658_v12 = vadd.f32 %v3671_v11, %v3670_v9 }
 0x243   : > { %v1372_v16 = vpop.f32.mrb[0].mxu1  ;;  %v3773_v36 = vpop.f32.mrb[96].mxu0 }
 0x244   : > { %v1886_v13 = vrot.slane %v1372_v16, 7  ;;  %v1735_v22 = vadd.f32 %v3773_v36, %v4582_v28  ;;  %v1374_v24 = vpop.f32.mrb[1].mxu1  ;;  %v1726_v29 = vpop.f32.mrb[97].mxu0 }
 0x245   : > { %v1727_v31 = vadd.f32 %v4570_v57, %v1726_v29  ;;  %v1376_v33 = vpop.f32.mrb[2].mxu1  ;;  %v3774_v35 = vpop.f32.mrb[98].mxu0 }
 0x246   : > { %v1981_v43 = vsel %vm1885_vm1, 0.0, %v1886_v13  ;;  %v1887_v46 = vrot.slane %v1376_v33, 7  ;;  %v1738_v47 = vadd.f32 %v3774_v35, %v4587_v32  ;;  %v1378_v28 = vpop.f32.mrb[3].mxu1  ;;  %v1729_v50 = vpop.f32.mrb[99].mxu0  ;;  %v2018_v63 = vrot.slane %v1735_v22, 1 }
 0x247   : > { %v2560_v55 = vsel %vm4665_vm2, 0.0, %v1981_v43  ;;  %v1730_v58 = vadd.f32 %v4575_v23, %v1729_v50  ;;  %v2015_v6 = vrot.slane %v1727_v31, 1  ;;  %v4697_v22 = vadd.s32 56, %v4654_v7  ;;  %v4705_v35 = vld [vmem:[%s5148_s4] ss:$0 sm:$0xff] }
 0x248   : > { %v2656_v2 = vadd.f32 %v2560_v55, %v1374_v24  ;;  %v2020_v4 = vrot.slane %v1738_v47, 1  ;;  %v1888_v32 = vsel %vm1885_vm1, %v1886_v13, %v1887_v46  ;;  %v2183_v13 = vand.u32 15, %v4681_v61 }
 0x249   : > { %v2657_v9 = vadd.f32 %v1888_v32, %v1378_v28  ;;  %v2016_v11 = vrot.slane %v1730_v58, 1 }
 0x24a   : > { %v2021_v18 = vsel %vm2014_vm3, %v2018_v63, %v2020_v4  ;;  %vm4736_vm8 = vcmp.eq.s32.totalorder %v2183_v13, 15 }
 0x24b   : > { %v2017_v21 = vsel %vm2014_vm3, %v2015_v6, %v2016_v11  ;;  %v2019_v16 = vsel %vm2014_vm3, %v2016_v11, %v2018_v63  ;;  %v1382_v36 = vpop.f32.mrb[4].mxu1  ;;  %v3777_v56 = vpop.f32.mrb[100].mxu0 }
 0x24c   : > { %v2625_v24 = vsel %vm4676_vm4, 0.0, %v2019_v16  ;;  %v2688_v27 = vadd.f32 %v2656_v2, %v2017_v21  ;;  %v1889_v29 = vrot.slane %v1382_v36, 7  ;;  %v1751_v31 = vadd.f32 %v3777_v56, %v4603_v45  ;;  %v1384_v33 = vpop.f32.mrb[5].mxu1  ;;  %v1742_v39 = vpop.f32.mrb[101].mxu0 }
 0x24d   : > { %v2689_v41 = vadd.f32 %v2657_v9, %v2625_v24  ;;  %v1743_v43 = vadd.f32 %v4594_v38, %v1742_v39  ;;  %v1386_v47 = vpop.f32.mrb[6].mxu1  ;;  %v3778_v28 = vpop.f32.mrb[102].mxu0 }
 0x24e   : > { %v2026_v45 = vrot.slane %v1751_v31, 1  ;;  %v1890_v55 = vsel %vm1885_vm1, %v1887_v46, %v1889_v29  ;;  %v1891_v58 = vrot.slane %v1386_v47, 7  ;;  %v1754_v57 = vadd.f32 %v3778_v28, %v4605_v48  ;;  %v1388_v61 = vpop.f32.mrb[7].mxu1  ;;  %v1745_v63 = vpop.f32.mrb[103].mxu0 }
 0x24f   : > { %v2562_v38 = vsel %vm4685_vm5, 0.0, %v1890_v55  ;;  %v2022_v2 = vrot.slane %v1743_v43, 1  ;;  %v1746_v32 = vadd.f32 %v4599_v42, %v1745_v63  ;;  %v2727_v6 = vadd.f32 %v4705_v35, %v2688_v27 }
 0x250   : > { %v2658_v9 = vadd.f32 %v2562_v38, %v1384_v33  ;;  %v2028_v11 = vrot.slane %v1754_v57, 1  ;;  %v1892_v17 = vsel %vm1885_vm1, %v1889_v29, %v1891_v58  ;;  %v2728_v21 = vadd.f32 %v4705_v35, %v2689_v41 }
 0x251   : > { %v2023_v46 = vsel %vm2014_vm3, %v2020_v4, %v2022_v2  ;;  %v2659_v16 = vadd.f32 %v1892_v17, %v1388_v61  ;;  %v2024_v48 = vrot.slane %v1746_v32, 1  ;;  %v2759_v36 = vmax.f32 %v2727_v6, 0.0 }
 0x252   : > { %v2690_v56 = vadd.f32 %v2658_v9, %v2021_v18  ;;  %v2627_v23 = vsel %vm4689_vm6, 0.0, %v2023_v46  ;;  %v2760_v24 = vmax.f32 %v2728_v21, 0.0  ;;  %v4727_v42 = vsel %vm2014_vm3, %v2026_v45, %v2028_v11 }
 0x253   : > { %v2691_v27 = vadd.f32 %v2659_v16, %v2627_v23  ;;  %v1392_v31 = vpop.f32.mrb[8].mxu1  ;;  %v3781_v33 = vpop.f32.mrb[104].mxu0  ;;  %v2025_v29 = vsel %vm2014_vm3, %v2022_v2, %v2024_v48  ;;  %v2027_v39 = vsel %vm2014_vm3, %v2024_v48, %v2026_v45  ;;  %v2197_v4 = vand.u32 15, %v4697_v22 }
 0x254   : > { %v2729_v41 = vadd.f32 %v4705_v35, %v2690_v56  ;;  %v1893_v43 = vrot.slane %v1392_v31, 7  ;;  %v1767_v18 = vadd.f32 %v3781_v33, %v4614_v59  ;;  %v1394_v20 = vpop.f32.mrb[9].mxu1  ;;  %v1758_v47 = vpop.f32.mrb[105].mxu0  ;;  %v2791_v28 = vpack.c.bf16 %v2760_v24, %v2759_v36 }
 0x255   : > { %v2730_v55 = vadd.f32 %v4705_v35, %v2691_v27  ;;  %v1759_v57 = vadd.f32 %v4609_v51, %v1758_v47  ;;  %v1396_v61 = vpop.f32.mrb[10].mxu1  ;;  %v3782_v63 = vpop.f32.mrb[106].mxu0  ;;  %v2121_v22 = vadd.s32 72, %v4654_v7  ;;  %v2190_v9 = vand.u32 15, %v4713_v52 }
 0x256   : > { %v2761_v45 = vmax.f32 %v2729_v41, 0.0  ;;  %v1894_v2 = vsel %vm1885_vm1, %v1891_v58, %v1893_v43  ;;  %v1895_v32 = vrot.slane %v1396_v61, 7  ;;  %3819 = vmatprep.mubr.bf16.mxu0 %v2791_v28  ;;  %v1398_v59 = vpop.f32.mrb[11].mxu1  ;;  %v1761_v6 = vpop.f32.mrb[107].mxu0  ;;  %v1770_v13 = vadd.f32 %v3782_v63, %v4616_v62 }
 0x257   : > { %v2762_v17 = vmax.f32 %v2730_v55, 0.0  ;;  %v2564_v51 = vsel %vm4708_vm7, 0.0, %v1894_v2  ;;  %v2030_v21 = vrot.slane %v1759_v57, 1  ;;  %vm4746_vm9 = vcmp.eq.s32.totalorder %v2197_v4, 15 }
 0x258   : > { %v2034_v16 = vrot.slane %v1767_v18, 1  ;;  %v2660_v48 = vadd.f32 %v2564_v51, %v1394_v20  ;;  %v1896_v58 = vsel %vm1885_vm1, %v1893_v43, %v1895_v32  ;;  %v1762_v36 = vadd.f32 %v4611_v54, %v1761_v6 }
 0x259   : > { %v2792_v56 = vpack.c.bf16 %v2762_v17, %v2761_v45  ;;  %v2036_v23 = vrot.slane %v1770_v13, 1  ;;  %v2661_v52 = vadd.f32 %v1896_v58, %v1398_v59  ;;  %v2031_v24 = vsel %vm2014_vm3, %v2028_v11, %v2030_v21 }
 0x25a   : > { %v2692_v50 = vadd.f32 %v2660_v48, %v2025_v29  ;;  %v2629_v27 = vsel %vm4736_vm8, 0.0, %v2027_v39  ;;  %v2032_v62 = vrot.slane %v1762_v36, 1  ;;  %v2120_v31 = vadd.s32 64, %v4654_v7 }
 0x25b   : > { %v2693_v33 = vadd.f32 %v2661_v52, %v2629_v27  ;;  %v1402_v4 = vpop.f32.mrb[12].mxu1  ;;  %v3785_v41 = vpop.f32.mrb[108].mxu0  ;;  %3820 = vmatmul.mubr.bf16.vlgmr.msra.gmra.mrb[128].mxu0 %v2792_v56  ;;  %vm4756_vm10 = vcmp.eq.s32.totalorder %v2190_v9, 0  ;;  %v2211_v54 = vand.u32 15, %v2121_v22  ;;  %v4761_v18 = vsel %vm2014_vm3, %v2034_v16, %v2036_v23 }
 0x25c   : > { %v2731_v11 = vadd.f32 %v4705_v35, %v2692_v50  ;;  %v1897_v29 = vrot.slane %v1402_v4, 7  ;;  %v1783_v39 = vadd.f32 %v3785_v41, %v4622_v8  ;;  %v1404_v20 = vpop.f32.mrb[13].mxu1  ;;  %v1774_v47 = vpop.f32.mrb[109].mxu0  ;;  %v4766_v28 = vsel %vm2014_vm3, %v2030_v21, %v2032_v62 }
 0x25d   : > { %v2732_v55 = vadd.f32 %v4705_v35, %v2693_v33  ;;  %v1775_v57 = vadd.f32 %v4618_v1, %v1774_v47  ;;  %v1406_v61 = vpop.f32.mrb[14].mxu1  ;;  %v3786_v63 = vpop.f32.mrb[110].mxu0  ;;  %v4771_v38 = vsel %vm2014_vm3, %v2032_v62, %v2034_v16  ;;  %v2123_v22 = vadd.s32 88, %v4654_v7 }
 0x25e   : > { %v2763_v45 = vmax.f32 %v2731_v11, 0.0  ;;  %v1898_v2 = vsel %vm1885_vm1, %v1895_v32, %v1897_v29  ;;  %v1899_v8 = vrot.slane %v1406_v61, 7  ;;  %v1408_v59 = vpop.f32.mrb[15].mxu1  ;;  %v1777_v6 = vpop.f32.mrb[111].mxu0  ;;  %v2204_v9 = vand.u32 15, %v2120_v31 }
 0x25f   : > { %v2764_v17 = vmax.f32 %v2732_v55, 0.0  ;;  %v2566_v51 = vsel %vm4756_vm10, 0.0, %v1898_v2  ;;  %v2038_v21 = vrot.slane %v1775_v57, 1  ;;  %v1786_v1 = vadd.f32 %v3786_v63, %v4624_v10 }
 0x260   : > { %vm4778_vm11 = vcmp.eq.s32.totalorder %v2211_v54, 15  ;;  %v2042_v16 = vrot.slane %v1783_v39, 1  ;;  %v2662_v48 = vadd.f32 %v2566_v51, %v1404_v20  ;;  %v1900_v58 = vsel %vm1885_vm1, %v1897_v29, %v1899_v8 }
 0x261   : > { %v1778_v32 = vadd.f32 %v4620_v5, %v1777_v6  ;;  %v2044_v36 = vrot.slane %v1786_v1, 1  ;;  %v2663_v56 = vadd.f32 %v1900_v58, %v1408_v59  ;;  %v2793_v52 = vpack.c.bf16 %v2764_v17, %v2763_v45 }
 0x262   : > { %v4785_v50 = vsel %vm2014_vm3, %v2036_v23, %v2038_v21  ;;  %v2694_v27 = vadd.f32 %v2662_v48, %v4727_v42  ;;  %v2631_v10 = vsel %vm4746_vm9, 0.0, %v2031_v24  ;;  %v2122_v31 = vadd.s32 80, %v4654_v7 }
 0x263   : > { %v2040_v62 = vrot.slane %v1778_v32, 1  ;;  %v2695_v33 = vadd.f32 %v2663_v56, %v2631_v10  ;;  %v1412_v4 = vpop.f32.mrb[16].mxu1  ;;  %v3789_v41 = vpop.f32.mrb[112].mxu0  ;;  %3823 = vmatprep.mubr.bf16.mxu0 %v2793_v52  ;;  %vm4791_vm12 = vcmp.eq.s32.totalorder %v2204_v9, 0  ;;  %v2225_v43 = vand.u32 15, %v2123_v22 }
 0x264   : > { %v4796_v23 = vsel %vm2014_vm3, %v2042_v16, %v2044_v36  ;;  %v2733_v42 = vadd.f32 %v4705_v35, %v2694_v27  ;;  %v1901_v54 = vrot.slane %v1412_v4, 7  ;;  %v1799_v46 = vadd.f32 %v3789_v41, %v4630_v3  ;;  %v1414_v24 = vpop.f32.mrb[17].mxu1  ;;  %v1790_v11 = vpop.f32.mrb[113].mxu0 }
 0x265   : > { %v4801_v29 = vsel %vm2014_vm3, %v2038_v21, %v2040_v62  ;;  %v2734_v39 = vadd.f32 %v4705_v35, %v2695_v33  ;;  %v1791_v20 = vadd.f32 %v4626_v15, %v1790_v11  ;;  %v1416_v47 = vpop.f32.mrb[18].mxu1  ;;  %v3790_v55 = vpop.f32.mrb[114].mxu0  ;;  %v4806_v57 = vsel %vm2014_vm3, %v2040_v62, %v2042_v16 }
 0x266   : > { %v2125_v61 = vadd.s32 104, %v4654_v7  ;;  %v2765_v63 = vmax.f32 %v2733_v42, 0.0  ;;  %v1902_v22 = vsel %vm1885_vm1, %v1899_v8, %v1901_v54  ;;  %v1903_v3 = vrot.slane %v1416_v47, 7  ;;  %v1418_v45 = vpop.f32.mrb[19].mxu1  ;;  %v1793_v2 = vpop.f32.mrb[115].mxu0 }
 0x267   : > { %v2218_v59 = vand.u32 15, %v2122_v31  ;;  %v2766_v6 = vmax.f32 %v2734_v39, 0.0  ;;  %v2568_v9 = vsel %vm4791_vm12, 0.0, %v1902_v22  ;;  %v2046_v17 = vrot.slane %v1791_v20, 1 }
 0x268   : > { %v1802_v15 = vadd.f32 %v3790_v55, %v4632_v37  ;;  %vm4813_vm13 = vcmp.eq.s32.totalorder %v2225_v43, 15  ;;  %v2050_v21 = vrot.slane %v1799_v46, 1  ;;  %v2664_v1 = vadd.f32 %v2568_v9, %v1414_v24 }
 0x269   : > { %v1904_v16 = vsel %vm1885_vm1, %v1901_v54, %v1903_v3  ;;  %v1794_v8 = vadd.f32 %v4628_v19, %v1793_v2  ;;  %v2794_v32 = vpack.c.bf16 %v2766_v6, %v2765_v63  ;;  %v4820_v56 = vsel %vm2014_vm3, %v2044_v36, %v2046_v17 }
 0x26a   : > { %v2052_v48 = vrot.slane %v1802_v15, 1  ;;  %v2665_v58 = vadd.f32 %v1904_v16, %v1418_v45  ;;  %v2696_v52 = vadd.f32 %v2664_v1, %v4766_v28  ;;  %v2633_v37 = vsel %vm4778_vm11, 0.0, %v4771_v38 }
 0x26b   : > { %v2048_v27 = vrot.slane %v1794_v8, 1  ;;  %v2124_v10 = vadd.s32 96, %v4654_v7  ;;  %v1422_v31 = vpop.f32.mrb[20].mxu1  ;;  %v3793_v33 = vpop.f32.mrb[116].mxu0  ;;  %3824 = vmatmul.mubr.bf16.gmra.mrb[132].mxu0 %v2794_v32  ;;  %vm4827_vm14 = vcmp.eq.s32.totalorder %v2218_v59, 0  ;;  %v2239_v4 = vand.u32 15, %v2125_v61 }
 0x26c   : > { %v2697_v62 = vadd.f32 %v2665_v58, %v2633_v37  ;;  %v4832_v36 = vsel %vm2014_vm3, %v2050_v21, %v2052_v48  ;;  %v2735_v28 = vadd.f32 %v4705_v35, %v2696_v52  ;;  %v1905_v41 = vrot.slane %v1422_v31, 7  ;;  %v1424_v13 = vpop.f32.mrb[21].mxu1  ;;  %v1806_v5 = vpop.f32.mrb[117].mxu0 }
 0x26d   : > { %v1815_v38 = vadd.f32 %v3793_v33, %v4638_v30  ;;  %v4837_v43 = vsel %vm2014_vm3, %v2046_v17, %v2048_v27  ;;  %v1807_v54 = vadd.f32 %v4634_v14, %v1806_v5  ;;  %v1426_v46 = vpop.f32.mrb[22].mxu1  ;;  %v3794_v24 = vpop.f32.mrb[118].mxu0  ;;  %v4842_v11 = vadd.s32 120, %v4654_v7 }
 0x26e   : > { %v2736_v42 = vadd.f32 %v4705_v35, %v2697_v62  ;;  %v4845_v39 = vsel %vm2014_vm3, %v2048_v27, %v2050_v21  ;;  %v2767_v20 = vmax.f32 %v2735_v28, 0.0  ;;  %v1906_v30 = vsel %vm1885_vm1, %v1903_v3, %v1905_v41  ;;  %v1428_v55 = vpop.f32.mrb[23].mxu1  ;;  %v1809_v61 = vpop.f32.mrb[119].mxu0 }
 0x26f   : > { %v1907_v47 = vrot.slane %v1426_v46, 7  ;;  %v2232_v63 = vand.u32 15, %v2124_v10  ;;  %v2570_v45 = vsel %vm4827_vm14, 0.0, %v1906_v30  ;;  %v2054_v14 = vrot.slane %v1807_v54, 1 }
 0x270   : > { %v2768_v22 = vmax.f32 %v2736_v42, 0.0  ;;  %v1818_v2 = vadd.f32 %v3794_v24, %v4640_v34  ;;  %vm4851_vm15 = vcmp.eq.s32.totalorder %v2239_v4, 15  ;;  %v2058_v6 = vrot.slane %v1815_v38, 1 }
 0x271   : > { %v2666_v9 = vadd.f32 %v2570_v45, %v1424_v13  ;;  %v1908_v17 = vsel %vm1885_vm1, %v1905_v41, %v1907_v47  ;;  %v1810_v3 = vadd.f32 %v4636_v26, %v1809_v61  ;;  %v4858_v16 = vsel %vm2014_vm3, %v2052_v48, %v2054_v14 }
 0x272   : > { %v2060_v15 = vrot.slane %v1818_v2, 1  ;;  %v2667_v21 = vadd.f32 %v1908_v17, %v1428_v55  ;;  %v2795_v1 = vpack.c.bf16 %v2768_v22, %v2767_v20  ;;  %v2635_v34 = vsel %vm4813_vm13, 0.0, %v4785_v50 }
 0x273   : > { %v2698_v8 = vadd.f32 %v2666_v9, %v4761_v18  ;;  %v2056_v58 = vrot.slane %v1810_v3, 1  ;;  %v2126_v32 = vadd.s32 112, %v4654_v7  ;;  %v1432_v37 = vpop.f32.mrb[24].mxu1  ;;  %v3797_v27 = vpop.f32.mrb[120].mxu0  ;;  %vm4865_vm0 = vcmp.eq.s32.totalorder %v2232_v63, 0 }
 0x274   : > { %v2699_v52 = vadd.f32 %v2667_v21, %v2635_v34  ;;  %3827 = vmatprep.mubr.bf16.mxu0 %v2795_v1  ;;  %v2253_v48 = vand.u32 15, %v4842_v11  ;;  %v4871_v10 = vsel %vm2014_vm3, %v2058_v6, %v2060_v15  ;;  %v1909_v51 = vrot.slane %v1432_v37, 7  ;;  %v1434_v62 = vpop.f32.mrb[25].mxu1  ;;  %v1822_v31 = vpop.f32.mrb[121].mxu0 }
 0x275   : > { %v2737_v18 = vadd.f32 %v4705_v35, %v2698_v8  ;;  %v1831_v50 = vadd.f32 %v3797_v27, %v4646_v49  ;;  %v4876_v33 = vsel %vm2014_vm3, %v2054_v14, %v2056_v58  ;;  %v1823_v4 = vadd.f32 %v4642_v40, %v1822_v31  ;;  %v1436_v28 = vpop.f32.mrb[26].mxu1  ;;  %v3798_v41 = vpop.f32.mrb[122].mxu0 }
 0x276   : > { %v2738_v19 = vadd.f32 %v4705_v35, %v2699_v52  ;;  %v4881_v38 = vadd.s32 136, %v4654_v7  ;;  %v4884_v13 = vsel %vm2014_vm3, %v2056_v58, %v2058_v6  ;;  %v1910_v49 = vsel %vm1885_vm1, %v1907_v47, %v1909_v51  ;;  %v1438_v54 = vpop.f32.mrb[27].mxu1  ;;  %v1825_v46 = vpop.f32.mrb[123].mxu0 }
 0x277   : > { %v2769_v5 = vmax.f32 %v2737_v18, 0.0  ;;  %v1911_v42 = vrot.slane %v1436_v28, 7  ;;  %v2246_v24 = vand.u32 15, %v2126_v32  ;;  %v2572_v20 = vsel %vm4865_vm0, 0.0, %v1910_v49 }
 0x278   : > { %v2770_v11 = vmax.f32 %v2738_v19, 0.0  ;;  %v2062_v40 = vrot.slane %v1823_v4, 1  ;;  %v1834_v30 = vadd.f32 %v3798_v41, %v4648_v53  ;;  %v2066_v55 = vrot.slane %v1831_v50, 1 }
 0x279   : > { %v2668_v61 = vadd.f32 %v2572_v20, %v1434_v62  ;;  %v1912_v63 = vsel %vm1885_vm1, %v1909_v51, %v1911_v42  ;;  %v1826_v22 = vadd.f32 %v4644_v44, %v1825_v46  ;;  %v2637_v9 = vsel %vm4851_vm15, 0.0, %v4806_v57 }
 0x27a   : > { %v2068_v45 = vrot.slane %v1834_v30, 1  ;;  %v2669_v14 = vadd.f32 %v1912_v63, %v1438_v54  ;;  %v2796_v47 = vpack.c.bf16 %v2770_v11, %v2769_v5  ;;  %v4893_v2 = vsel %vm2014_vm3, %v2060_v15, %v2062_v40 }
 0x27b   : > { %v2700_v6 = vadd.f32 %v2668_v61, %v4801_v29  ;;  %v2064_v17 = vrot.slane %v1826_v22, 1  ;;  %v2128_v53 = vadd.s32 128, %v4654_v7  ;;  %v1442_v21 = vpop.f32.mrb[28].mxu1  ;;  %v3801_v1 = vpop.f32.mrb[124].mxu0  ;;  %vm4900_vm2 = vcmp.eq.s32.totalorder %v2246_v24, 0 }
 0x27c   : > { %v2701_v3 = vadd.f32 %v2669_v14, %v2637_v9  ;;  %3828 = vmatmul.mubr.bf16.gmra.mrb[136].mxu0 %v2796_v47  ;;  %vm4904_vm4 = vcmp.eq.s32.totalorder %v2253_v48, 15  ;;  %v4909_v29 = vsel %vm2014_vm3, %v2066_v55, %v2068_v45  ;;  %v1913_v59 = vrot.slane %v1442_v21, 7  ;;  %v1444_v34 = vpop.f32.mrb[29].mxu1  ;;  %v1838_v58 = vpop.f32.mrb[125].mxu0 }
 0x27d   : > { %v2739_v57 = vadd.f32 %v4705_v35, %v2700_v6  ;;  %v1847_v8 = vadd.f32 %v3801_v1, %v4656_v25  ;;  %v4914_v32 = vsel %vm2014_vm3, %v2062_v40, %v2064_v17  ;;  %v1839_v37 = vadd.f32 %v4650_v60, %v1838_v58  ;;  %v1446_v27 = vpop.f32.mrb[30].mxu1  ;;  %v3802_v26 = vpop.f32.mrb[126].mxu0 }
 0x27e   : > { %v2740_v52 = vadd.f32 %v4705_v35, %v2701_v3  ;;  %v2267_v48 = vand.u32 15, %v4881_v38  ;;  %v4920_v18 = vsel %vm2014_vm3, %v2064_v17, %v2066_v55  ;;  %v1914_v50 = vsel %vm1885_vm1, %v1911_v42, %v1913_v59  ;;  %v1448_v62 = vpop.f32.mrb[31].mxu1  ;;  %v1841_v31 = vpop.f32.mrb[127].mxu0 }
 0x27f   : > { %v2771_v51 = vmax.f32 %v2739_v57, 0.0  ;;  %v1915_v25 = vrot.slane %v1446_v27, 7  ;;  %v2260_v19 = vand.u32 15, %v2128_v53  ;;  %v2574_v28 = vsel %vm4900_vm2, 0.0, %v1914_v50 }
 0x280   : > { %v2772_v4 = vmax.f32 %v2740_v52, 0.0  ;;  %v2070_v41 = vrot.slane %v1839_v37, 1  ;;  %v1850_v60 = vadd.f32 %v3802_v26, %v4658_v12  ;;  %v2074_v5 = vrot.slane %v1847_v8, 1 }
 0x281   : > { %v2670_v49 = vadd.f32 %v2574_v28, %v1444_v34  ;;  %v1916_v38 = vsel %vm1885_vm1, %v1913_v59, %v1915_v25  ;;  %v1842_v54 = vadd.f32 %v4652_v0, %v1841_v31  ;;  %v2639_v40 = vsel %vm4904_vm4, 0.0, %v4820_v56 }
 0x282   : > { %v2076_v46 = vrot.slane %v1850_v60, 1  ;;  %v2671_v24 = vadd.f32 %v1916_v38, %v1448_v62  ;;  %v2797_v42 = vpack.c.bf16 %v2772_v4, %v2771_v51  ;;  %v4929_v11 = vsel %vm2014_vm3, %v2068_v45, %v2070_v41 }
 0x283   : > { %v2702_v20 = vadd.f32 %v2670_v49, %v4796_v23  ;;  %v2072_v30 = vrot.slane %v1842_v54, 1  ;;  %vm4935_vm5 = vcmp.eq.s32.totalorder %v2260_v19, 0  ;;  %v1452_v61 = vpop.f32.mrb[32].mxu1  ;;  %v2130_v63 = vadd.s32 144, %v4654_v7 }
 0x284   : > { %v4940_v55 = vsel %vm2014_vm3, %v2076_v46, 0.0  ;;  %v2703_v0 = vadd.f32 %v2671_v24, %v2639_v40  ;;  %3831 = vmatprep.mubr.bf16.mxu0 %v2797_v42  ;;  %v4944_v22 = vsel %vm2014_vm3, %v2074_v5, %v2076_v46  ;;  %v1917_v45 = vrot.slane %v1452_v61, 7  ;;  %v1454_v56 = vpop.f32.mrb[33].mxu1 }
 0x285   : > { %v2741_v23 = vadd.f32 %v4705_v35, %v2702_v20  ;;  %v4948_v14 = vsel %vm2014_vm3, %v2070_v41, %v2072_v30  ;;  %v4951_v47 = vsel %vm2014_vm3, %v2072_v30, %v2074_v5  ;;  %v1456_v9 = vpop.f32.mrb[34].mxu1  ;;  %vm2609_vm6 = vcmp.eq.s32.totalorder %v2267_v48, 15 }
 0x286   : > { %v2742_v6 = vadd.f32 %v4705_v35, %v2703_v0  ;;  %v1918_v53 = vsel %vm1885_vm1, %v1915_v25, %v1917_v45  ;;  %v1919_v3 = vrot.slane %v1456_v9, 7  ;;  %v1458_v21 = vpop.f32.mrb[35].mxu1  ;;  %v2131_v15 = vadd.s32 152, %v4654_v7 }
 0x287   : > { %v2773_v17 = vmax.f32 %v2741_v23, 0.0  ;;  %v2576_v44 = vsel %vm4935_vm5, 0.0, %v1918_v53  ;;  %v2274_v8 = vand.u32 15, %v2130_v63  ;;  %v2641_v37 = vsel %vm2609_vm6, 0.0, %v4845_v39 }
 0x288   : > { %v2774_v1 = vmax.f32 %v2742_v6, 0.0  ;;  %v2672_v57 = vadd.f32 %v2576_v44, %v1454_v56  ;;  %v1920_v59 = vsel %vm1885_vm1, %v1917_v45, %v1919_v3  ;;  %v2281_v51 = vand.u32 15, %v2131_v15 }
 0x289   : > { %v2673_v34 = vadd.f32 %v1920_v59, %v1458_v21  ;;  %vm2546_vm3 = vcmp.eq.s32.totalorder %v2274_v8, 0  ;;  %v2132_v62 = vadd.s32 160, %v4654_v7  ;;  %v2133_v5 = vadd.s32 168, %v4654_v7 }
 0x28a   : > { %v2798_v58 = vpack.c.bf16 %v2774_v1, %v2773_v17  ;;  %v2704_v52 = vadd.f32 %v2672_v57, %v4837_v43  ;;  %vm2611_vm7 = vcmp.eq.s32.totalorder %v2281_v51, 15  ;;  %v2134_v23 = vadd.s32 176, %v4654_v7 }
 0x28b   : > { %v2705_v27 = vadd.f32 %v2673_v34, %v2641_v37  ;;  %v1462_v26 = vpop.f32.mrb[36].mxu1  ;;  %v2288_v54 = vand.u32 15, %v2132_v62  ;;  %v2643_v20 = vsel %vm2611_vm7, 0.0, %v4858_v16  ;;  %v2295_v12 = vand.u32 15, %v2133_v5 }
 0x28c   : > { %3832 = vmatmul.mubr.bf16.gmra.mrb[140].mxu0 %v2798_v58  ;;  %v2743_v50 = vadd.f32 %v4705_v35, %v2704_v52  ;;  %v1921_v25 = vrot.slane %v1462_v26, 7  ;;  %v1464_v48 = vpop.f32.mrb[37].mxu1  ;;  %v2302_v44 = vand.u32 15, %v2134_v23  ;;  %v2136_v51 = vadd.s32 192, %v4654_v7 }
 0x28d   : > { %v2744_v31 = vadd.f32 %v4705_v35, %v2705_v27  ;;  %v1466_v19 = vpop.f32.mrb[38].mxu1  ;;  %vm2548_vm8 = vcmp.eq.s32.totalorder %v2288_v54, 0  ;;  %vm2613_vm9 = vcmp.eq.s32.totalorder %v2295_v12, 15 }
 0x28e   : > { %v2775_v4 = vmax.f32 %v2743_v50, 0.0  ;;  %v1922_v28 = vsel %vm1885_vm1, %v1919_v3, %v1921_v25  ;;  %v1923_v43 = vrot.slane %v1466_v19, 7  ;;  %v1468_v41 = vpop.f32.mrb[39].mxu1  ;;  %v2135_v3 = vadd.s32 184, %v4654_v7 }
 0x28f   : > { %v2776_v39 = vmax.f32 %v2744_v31, 0.0  ;;  %v2578_v60 = vsel %vm2546_vm3, 0.0, %v1922_v28  ;;  %v2645_v8 = vsel %vm2613_vm9, 0.0, %v4884_v13  ;;  %vm2550_vm10 = vcmp.eq.s32.totalorder %v2302_v44, 0 }
 0x290   : > { %v2674_v49 = vadd.f32 %v2578_v60, %v1464_v48  ;;  %v1924_v38 = vsel %vm1885_vm1, %v1921_v25, %v1923_v43  ;;  %v2309_v52 = vand.u32 15, %v2135_v3 }
 0x291   : > { %v2675_v46 = vadd.f32 %v1924_v38, %v1468_v41  ;;  %v2799_v24 = vpack.c.bf16 %v2776_v39, %v2775_v4  ;;  %v2137_v4 = vadd.s32 200, %v4654_v7  ;;  %v2316_v41 = vand.u32 15, %v2136_v51 }
 0x292   : > { %v2706_v42 = vadd.f32 %v2674_v49, %v4832_v36  ;;  %vm2615_vm11 = vcmp.eq.s32.totalorder %v2309_v52, 15 }
 0x293   : > { %v2707_v40 = vadd.f32 %v2675_v46, %v2643_v20  ;;  %v1472_v30 = vpop.f32.mrb[40].mxu1  ;;  %3835 = vmatprep.mubr.bf16.mxu0 %v2799_v24  ;;  %v2647_v49 = vsel %vm2615_vm11, 0.0, %v4893_v2  ;;  %v2323_v46 = vand.u32 15, %v2137_v4  ;;  %vm2552_vm12 = vcmp.eq.s32.totalorder %v2316_v41, 0 }
 0x294   : > { %v2745_v0 = vadd.f32 %v4705_v35, %v2706_v42  ;;  %v1925_v61 = vrot.slane %v1472_v30, 7  ;;  %v1474_v63 = vpop.f32.mrb[41].mxu1 }
 0x295   : > { %v2746_v45 = vadd.f32 %v4705_v35, %v2707_v40  ;;  %v1476_v56 = vpop.f32.mrb[42].mxu1  ;;  %v2138_v40 = vadd.s32 208, %v4654_v7  ;;  %vm2617_vm13 = vcmp.eq.s32.totalorder %v2323_v46, 15 }
 0x296   : > { %v2777_v6 = vmax.f32 %v2745_v0, 0.0  ;;  %v1926_v9 = vsel %vm1885_vm1, %v1923_v43, %v1925_v61  ;;  %v1927_v36 = vrot.slane %v1476_v56, 7  ;;  %v1478_v17 = vpop.f32.mrb[43].mxu1 }
 0x297   : > { %v2778_v16 = vmax.f32 %v2746_v45, 0.0  ;;  %v2580_v53 = vsel %vm2548_vm8, 0.0, %v1926_v9  ;;  %v2139_v45 = vadd.s32 216, %v4654_v7  ;;  %v2330_v9 = vand.u32 15, %v2138_v40 }
 0x298   : > { %v2676_v21 = vadd.f32 %v2580_v53, %v1474_v63  ;;  %v1928_v1 = vsel %vm1885_vm1, %v1925_v61, %v1927_v36  ;;  %v2649_v53 = vsel %vm2617_vm13, 0.0, %v4920_v18 }
 0x299   : > { %v2677_v15 = vadd.f32 %v1928_v1, %v1478_v17  ;;  %v2800_v57 = vpack.c.bf16 %v2778_v16, %v2777_v6  ;;  %v2337_v1 = vand.u32 15, %v2139_v45  ;;  %vm2554_vm14 = vcmp.eq.s32.totalorder %v2330_v9, 0 }
 0x29a   : > { %v2708_v59 = vadd.f32 %v2676_v21, %v4876_v33 }
 0x29b   : > { %v2709_v34 = vadd.f32 %v2677_v15, %v2645_v8  ;;  %v1482_v58 = vpop.f32.mrb[44].mxu1  ;;  %3836 = vmatmul.mubr.bf16.gmra.mrb[144].mxu0 %v2800_v57  ;;  %vm2619_vm15 = vcmp.eq.s32.totalorder %v2337_v1, 15 }
 0x29c   : > { %v2747_v37 = vadd.f32 %v4705_v35, %v2708_v59  ;;  %v1929_v27 = vrot.slane %v1482_v58, 7  ;;  %v1484_v26 = vpop.f32.mrb[45].mxu1  ;;  %v2140_v59 = vadd.s32 224, %v4654_v7 }
 0x29d   : > { %v2748_v50 = vadd.f32 %v4705_v35, %v2709_v34  ;;  %v1486_v25 = vpop.f32.mrb[46].mxu1 }
 0x29e   : > { %v2779_v48 = vmax.f32 %v2747_v37, 0.0  ;;  %v1930_v62 = vsel %vm1885_vm1, %v1927_v36, %v1929_v27  ;;  %v1931_v33 = vrot.slane %v1486_v25, 7  ;;  %v1488_v31 = vpop.f32.mrb[47].mxu1  ;;  %v2344_v25 = vand.u32 15, %v2140_v59 }
 0x29f   : > { %v2780_v13 = vmax.f32 %v2748_v50, 0.0  ;;  %v2582_v19 = vsel %vm2550_vm10, 0.0, %v1930_v62 }
 0x2a0   : > { %v2678_v28 = vadd.f32 %v2582_v19, %v1484_v26  ;;  %v1932_v43 = vsel %vm1885_vm1, %v1929_v27, %v1931_v33  ;;  %v2141_v26 = vadd.s32 232, %v4654_v7  ;;  %vm2556_vm0 = vcmp.eq.s32.totalorder %v2344_v25, 0 }
 0x2a1   : > { %v2679_v39 = vadd.f32 %v1932_v43, %v1488_v31  ;;  %v2801_v60 = vpack.c.bf16 %v2780_v13, %v2779_v48  ;;  %v2651_v31 = vsel %vm2619_vm15, 0.0, %v4929_v11 }
 0x2a2   : > { %v2710_v5 = vadd.f32 %v2678_v28, %v4871_v10  ;;  %v2351_v4 = vand.u32 15, %v2141_v26 }
 0x2a3   : > { %v2711_v38 = vadd.f32 %v2679_v39, %v2647_v49  ;;  %v1492_v54 = vpop.f32.mrb[48].mxu1  ;;  %3839 = vmatprep.mubr.bf16.mxu0 %v2801_v60  ;;  %v2142_v39 = vadd.s32 240, %v4654_v7 }
 0x2a4   : > { %v2749_v24 = vadd.f32 %v4705_v35, %v2710_v5  ;;  %v1933_v42 = vrot.slane %v1492_v54, 7  ;;  %v1494_v20 = vpop.f32.mrb[49].mxu1  ;;  %vm2621_vm2 = vcmp.eq.s32.totalorder %v2351_v4, 15 }
 0x2a5   : > { %v2750_v30 = vadd.f32 %v4705_v35, %v2711_v38  ;;  %v1496_v12 = vpop.f32.mrb[50].mxu1  ;;  %v2358_v40 = vand.u32 15, %v2142_v39 }
 0x2a6   : > { %v2781_v0 = vmax.f32 %v2749_v24, 0.0  ;;  %v1934_v61 = vsel %vm1885_vm1, %v1931_v33, %v1933_v42  ;;  %v1935_v10 = vrot.slane %v1496_v12, 7  ;;  %v1498_v63 = vpop.f32.mrb[51].mxu1  ;;  %v2143_v24 = vadd.s32 248, %v4654_v7 }
 0x2a7   : > { %v2782_v2 = vmax.f32 %v2750_v30, 0.0  ;;  %v2584_v23 = vsel %vm2552_vm12, 0.0, %v1934_v61  ;;  %v2653_v61 = vsel %vm2621_vm2, 0.0, %v4951_v47  ;;  %vm2558_vm4 = vcmp.eq.s32.totalorder %v2358_v40, 0 }
 0x2a8   : > { %v2680_v56 = vadd.f32 %v2584_v23, %v1494_v20  ;;  %v1936_v6 = vsel %vm1885_vm1, %v1933_v42, %v1935_v10 }
 0x2a9   : > { %v2681_v36 = vadd.f32 %v1936_v6, %v1498_v63  ;;  %v2802_v17 = vpack.c.bf16 %v2782_v2, %v2781_v0  ;;  %v2365_v2 = vand.u32 15, %v2143_v24  ;;  %v4064_v24 = vld [vmem:[%s4157_s16 + $0x10] sm:$0xff]  }
 0x2aa   : > { %v2712_v16 = vadd.f32 %v2680_v56, %v4914_v32 }
 0x2ab   : > { %v2713_v3 = vadd.f32 %v2681_v36, %v2649_v53  ;;  %v1502_v21 = vpop.f32.mrb[52].mxu1  ;;  %3840 = vmatmul.mubr.bf16.gmra.mrb[148].mxu0 %v2802_v17  ;;  %vm2623_vm5 = vcmp.eq.s32.totalorder %v2365_v2, 15 }
 0x2ac   : > { %v2751_v44 = vadd.f32 %v4705_v35, %v2712_v16  ;;  %v1937_v15 = vrot.slane %v1502_v21, 7  ;;  %v1504_v57 = vpop.f32.mrb[53].mxu1 }
 0x2ad   : > { %v2752_v8 = vadd.f32 %v4705_v35, %v2713_v3  ;;  %v1506_v34 = vpop.f32.mrb[54].mxu1 }
 0x2ae   : > { %v2783_v58 = vmax.f32 %v2751_v44, 0.0  ;;  %v1938_v52 = vsel %vm1885_vm1, %v1935_v10, %v1937_v15  ;;  %v1939_v32 = vrot.slane %v1506_v34, 7  ;;  %v1508_v37 = vpop.f32.mrb[55].mxu1 }
 0x2af   : > { %v2784_v18 = vmax.f32 %v2752_v8, 0.0  ;;  %v2586_v27 = vsel %vm2554_vm14, 0.0, %v1938_v52 }
 0x2b0   : > { %v2682_v51 = vadd.f32 %v2586_v27, %v1504_v57  ;;  %v1940_v50 = vsel %vm1885_vm1, %v1937_v15, %v1939_v32  ;;  %v2655_v15 = vsel %vm2623_vm5, 0.0, %v4940_v55 }
 0x2b1   : > { %v2683_v48 = vadd.f32 %v1940_v50, %v1508_v37  ;;  %v2803_v62 = vpack.c.bf16 %v2784_v18, %v2783_v58  ;;  %v4061_v37 = vld [vmem:[%s4157_s16 + $0x8] sm:$0xff]  }
 0x2b2   : > { %v2714_v33 = vadd.f32 %v2682_v51, %v4909_v29  ;;  %v3041_v18 = vunpack.c.l.bf16 %v4061_v37  ;;  %v3042_v50 = vunpack.c.h.bf16 %v4061_v37 }
 0x2b3   : > { %v2715_v13 = vadd.f32 %v2683_v48, %v2651_v31  ;;  %v1512_v19 = vpop.f32.mrb[56].mxu1  ;;  %3843 = vmatprep.mubr.bf16.mxu0 %v2803_v62 }
 0x2b4   : > { %v2753_v28 = vadd.f32 %v4705_v35, %v2714_v33  ;;  %v1941_v43 = vrot.slane %v1512_v19, 7  ;;  %v1514_v41 = vpop.f32.mrb[57].mxu1 }
 0x2b5   : > { %v2754_v60 = vadd.f32 %v4705_v35, %v2715_v13  ;;  %v1516_v5 = vpop.f32.mrb[58].mxu1 }
 0x2b6   : > { %v2785_v49 = vmax.f32 %v2753_v28, 0.0  ;;  %v1942_v38 = vsel %vm1885_vm1, %v1939_v32, %v1941_v43  ;;  %v1943_v29 = vrot.slane %v1516_v5, 7  ;;  %v1518_v54 = vpop.f32.mrb[59].mxu1  ;;  %v5020_v32 = vld [vmem:[%s5150_s6] ss:$0 sm:$0xff] }
 0x2b7   : > { %v2786_v11 = vmax.f32 %v2754_v60, 0.0  ;;  %v2588_v46 = vsel %vm2556_vm0, 0.0, %v1942_v38 }
 0x2b8   : > { %v2684_v42 = vadd.f32 %v2588_v46, %v1514_v41  ;;  %v1944_v20 = vsel %vm1885_vm1, %v1941_v43, %v1943_v29 }
 0x2b9   : > { %v2685_v30 = vadd.f32 %v1944_v20, %v1518_v54  ;;  %v2804_v12 = vpack.c.bf16 %v2786_v11, %v2785_v49  ;;  %v4063_v54 = vld [vmem:[%s4157_s16 + $0x18] sm:$0xff]  }
 0x2ba   : > { %v2716_v0 = vadd.f32 %v2684_v42, %v4948_v14  ;;  %v3045_v11 = vunpack.c.l.bf16 %v4063_v54  ;;  %v3043_v42 = vunpack.c.l.bf16 %v4064_v24 }
 0x2bb   : > { %v2717_v10 = vadd.f32 %v2685_v30, %v2653_v61  ;;  %v1522_v63 = vpop.f32.mrb[60].mxu1  ;;  %3844 = vmatmul.mubr.bf16.gmra.mrb[152].mxu0 %v2804_v12  ;;  %v3046_v30 = vunpack.c.h.bf16 %v4063_v54  ;;  %v3044_v61 = vunpack.c.h.bf16 %v4064_v24 }
 0x2bc   : > { %v2755_v23 = vadd.f32 %v4705_v35, %v2716_v0  ;;  %v1945_v45 = vrot.slane %v1522_v63, 7  ;;  %v1524_v56 = vpop.f32.mrb[61].mxu1 }
 0x2bd   : > { %v2756_v7 = vadd.f32 %v4705_v35, %v2717_v10  ;;  %v1526_v6 = vpop.f32.mrb[62].mxu1 }
 0x2be   : > { %v2787_v9 = vmax.f32 %v2755_v23, 0.0  ;;  %v1946_v36 = vsel %vm1885_vm1, %v1943_v29, %v1945_v45  ;;  %v1947_v17 = vrot.slane %v1526_v6, 7  ;;  %v1528_v16 = vpop.f32.mrb[63].mxu1 }
 0x2bf   : > { %v2788_v14 = vmax.f32 %v2756_v7, 0.0  ;;  %v2590_v53 = vsel %vm2558_vm4, 0.0, %v1946_v36 }
 0x2c0   : > { %v2686_v47 = vadd.f32 %v2590_v53, %v1524_v56  ;;  %v1948_v3 = vsel %vm1885_vm1, %v1945_v45, %v1947_v17  ;;  %vm3263_vm1 = vcmask 125952  }
 0x2c1   : > { %v2687_v21 = vadd.f32 %v1948_v3, %v1528_v16  ;;  %v2805_v1 = vpack.c.bf16 %v2788_v14, %v2787_v9  ;;  %v4065_v3 = vld [vmem:[%s4157_s16 + $0x28] sm:$0xff]  }
 0x2c2   : > { %v2718_v44 = vadd.f32 %v2686_v47, %v4944_v22  ;;  %v4062_v22 = vld [vmem:[%s4157_s16] sm:$0xff]  }
 0x2c3   : > { %v2719_v57 = vadd.f32 %v2687_v21, %v2655_v15  ;;  %3847 = vmatprep.mubr.bf16.mxu0 %v2805_v1  ;;  %v3039_v55 = vunpack.c.l.bf16 %v4062_v22  ;;  %v3049_v21 = vunpack.c.l.bf16 %v4065_v3 }
 0x2c4   : > { %v2757_v59 = vadd.f32 %v4705_v35, %v2718_v44  ;;  %v4066_v44 = vld [vmem:[%s4157_s16 + $0x20] sm:$0xff]  }
 0x2c5   : > { %v2758_v8 = vadd.f32 %v4705_v35, %v2719_v57  ;;  %v3040_v35 = vunpack.c.h.bf16 %v4062_v22  ;;  %v3047_v15 = vunpack.c.l.bf16 %v4066_v44 }
 0x2c6   : > { %v2789_v34 = vmax.f32 %v2757_v59, 0.0 }
 0x2c7   : > { %v2790_v58 = vmax.f32 %v2758_v8, 0.0  ;;  %v3050_v8 = vunpack.c.h.bf16 %v4065_v3 }
 0x2c9   : > { %v2806_v52 = vpack.c.bf16 %v2790_v58, %v2789_v34 }
 0x2cb   : > { %3848 = vmatmul.mubr.bf16.gmra.mrb[156].mxu0 %v2806_v52  ;;  %v3048_v52 = vunpack.c.h.bf16 %v4066_v44 }
 0x32e   : > { %v3821_v27 = vpop.f32.mrb[128].mxu0 }
 0x32f   : > { %v2921_v26 = vadd.f32 %v3821_v27, %v5020_v32  ;;  %v2912_v51 = vpop.f32.mrb[129].mxu0 }
 0x330   : > { %v2913_v25 = vadd.f32 %v5020_v32, %v2912_v51  ;;  %v3822_v48 = vpop.f32.mrb[130].mxu0 }
 0x331   : > { %v3073_v62 = vadd.f32 %v3041_v18, %v2921_v26  ;;  %v2924_v33 = vadd.f32 %v3822_v48, %v5020_v32  ;;  %v2915_v31 = vpop.f32.mrb[131].mxu0 }
 0x332   : > { %v3071_v13 = vadd.f32 %v3039_v55, %v2913_v25  ;;  %v2916_v19 = vadd.f32 %v5020_v32, %v2915_v31 }
 0x333   : > { %v3105_v4 = vmax.f32 %v3073_v62, 0.0  ;;  %v3074_v28 = vadd.f32 %v3042_v50, %v2924_v33 }
 0x334   : > { %v3103_v43 = vmax.f32 %v3071_v13, 0.0  ;;  %v3072_v41 = vadd.f32 %v3040_v35, %v2916_v19  ;;  %v4067_v19 = vld [vmem:[%s4157_s16 + $0x38] sm:$0xff]  }
 0x335   : > { %v3514_v39 = vpack.c.bf16 %v3105_v4, %v3105_v4  ;;  %v3106_v60 = vmax.f32 %v3074_v28, 0.0  ;;  %v3053_v4 = vunpack.c.l.bf16 %v4067_v19 }
 0x336   : > { %v3512_v5 = vpack.c.bf16 %v3103_v43, %v3103_v43  ;;  %v3104_v49 = vmax.f32 %v3072_v41, 0.0  ;;  %v4068_v43 = vld [vmem:[%s4157_s16 + $0x30] sm:$0xff]  }
 0x337   : > { %3266 = vst.msk [vmem:[%s5033_s27 + $0x8] sm:$0xf] %vm3263_vm1, %v3514_v39  ;;  %v3515_v38 = vpack.c.bf16 %v3106_v60, %v3106_v60  ;;  %v3051_v41 = vunpack.c.l.bf16 %v4068_v43 }
 0x338   : > { %3264 = vst.msk [vmem:[%s5033_s27] sm:$0xf] %vm3263_vm1, %v3512_v5  ;;  %v3513_v29 = vpack.c.bf16 %v3104_v49, %v3104_v49  ;;  %v3054_v5 = vunpack.c.h.bf16 %v4067_v19 }
 0x339   : > { %3267 = vst.msk [vmem:[%s5033_s27 + $0xc] sm:$0xf] %vm3263_vm1, %v3515_v38 }
 0x33a   : > { %3265 = vst.msk [vmem:[%s5033_s27 + $0x4] sm:$0xf] %vm3263_vm1, %v3513_v29  ;;  %v3052_v29 = vunpack.c.h.bf16 %v4068_v43 }
 0x33e   : > { %v3825_v46 = vpop.f32.mrb[132].mxu0 }
 0x33f   : > { %v2937_v20 = vadd.f32 %v3825_v46, %v5020_v32  ;;  %v2928_v40 = vpop.f32.mrb[133].mxu0 }
 0x340   : > { %v2929_v12 = vadd.f32 %v5020_v32, %v2928_v40  ;;  %v3826_v0 = vpop.f32.mrb[134].mxu0 }
 0x341   : > { %v3077_v10 = vadd.f32 %v3045_v11, %v2937_v20  ;;  %v2940_v63 = vadd.f32 %v3826_v0, %v5020_v32  ;;  %v2931_v2 = vpop.f32.mrb[135].mxu0 }
 0x342   : > { %v3075_v23 = vadd.f32 %v3043_v42, %v2929_v12  ;;  %v2932_v45 = vadd.f32 %v5020_v32, %v2931_v2 }
 0x343   : > { %v3109_v56 = vmax.f32 %v3077_v10, 0.0  ;;  %v3078_v7 = vadd.f32 %v3046_v30, %v2940_v63 }
 0x344   : > { %v3107_v6 = vmax.f32 %v3075_v23, 0.0  ;;  %v3076_v9 = vadd.f32 %v3044_v61, %v2932_v45  ;;  %v4069_v45 = vld [vmem:[%s4157_s16 + $0x48] sm:$0xff]  }
 0x345   : > { %v3518_v36 = vpack.c.bf16 %v3109_v56, %v3109_v56  ;;  %v3110_v17 = vmax.f32 %v3078_v7, 0.0  ;;  %v3057_v56 = vunpack.c.l.bf16 %v4069_v45 }
 0x346   : > { %v3516_v16 = vpack.c.bf16 %v3107_v6, %v3107_v6  ;;  %v3108_v14 = vmax.f32 %v3076_v9, 0.0  ;;  %v4070_v6 = vld [vmem:[%s4157_s16 + $0x40] sm:$0xff]  }
 0x347   : > { %3270 = vst.msk [vmem:[%s5033_s27 + $0x18] sm:$0xf] %vm3263_vm1, %v3518_v36  ;;  %v3519_v53 = vpack.c.bf16 %v3110_v17, %v3110_v17  ;;  %v3055_v9 = vunpack.c.l.bf16 %v4070_v6 }
 0x348   : > { %3268 = vst.msk [vmem:[%s5033_s27 + $0x10] sm:$0xf] %vm3263_vm1, %v3516_v16  ;;  %v3517_v47 = vpack.c.bf16 %v3108_v14, %v3108_v14  ;;  %v3058_v16 = vunpack.c.h.bf16 %v4069_v45 }
 0x349   : > { %3271 = vst.msk [vmem:[%s5033_s27 + $0x1c] sm:$0xf] %vm3263_vm1, %v3519_v53 }
 0x34a   : > { %3269 = vst.msk [vmem:[%s5033_s27 + $0x14] sm:$0xf] %vm3263_vm1, %v3517_v47  ;;  %v3056_v47 = vunpack.c.h.bf16 %v4070_v6 }
 0x34f   : > { %v3829_v1 = vpop.f32.mrb[136].mxu0 }
 0x350   : > { %v2953_v57 = vadd.f32 %v3829_v1, %v5020_v32  ;;  %v2944_v59 = vpop.f32.mrb[137].mxu0 }
 0x351   : > { %v2945_v34 = vadd.f32 %v5020_v32, %v2944_v59  ;;  %v3830_v58 = vpop.f32.mrb[138].mxu0 }
 0x352   : > { %v3081_v37 = vadd.f32 %v3049_v21, %v2953_v57  ;;  %v2956_v18 = vadd.f32 %v3830_v58, %v5020_v32  ;;  %v2947_v22 = vpop.f32.mrb[139].mxu0 }
 0x353   : > { %v3079_v55 = vadd.f32 %v3047_v15, %v2945_v34  ;;  %v2948_v27 = vadd.f32 %v5020_v32, %v2947_v22 }
 0x354   : > { %v3113_v26 = vmax.f32 %v3081_v37, 0.0  ;;  %v3082_v51 = vadd.f32 %v3050_v8, %v2956_v18 }
 0x355   : > { %v3111_v50 = vmax.f32 %v3079_v55, 0.0  ;;  %v3080_v35 = vadd.f32 %v3048_v52, %v2948_v27  ;;  %v4071_v27 = vld [vmem:[%s4157_s16 + $0x58] sm:$0xff]  }
 0x356   : > { %v3522_v25 = vpack.c.bf16 %v3113_v26, %v3113_v26  ;;  %v3114_v48 = vmax.f32 %v3082_v51, 0.0  ;;  %v3061_v26 = vunpack.c.l.bf16 %v4071_v27 }
 0x357   : > { %v3520_v62 = vpack.c.bf16 %v3111_v50, %v3111_v50  ;;  %v3112_v33 = vmax.f32 %v3080_v35, 0.0  ;;  %v4072_v50 = vld [vmem:[%s4157_s16 + $0x50] sm:$0xff]  }
 0x358   : > { %3274 = vst.msk [vmem:[%s5033_s27 + $0x28] sm:$0xf] %vm3263_vm1, %v3522_v25  ;;  %v3523_v31 = vpack.c.bf16 %v3114_v48, %v3114_v48  ;;  %v3059_v35 = vunpack.c.l.bf16 %v4072_v50 }
 0x359   : > { %3272 = vst.msk [vmem:[%s5033_s27 + $0x20] sm:$0xf] %vm3263_vm1, %v3520_v62  ;;  %v3521_v13 = vpack.c.bf16 %v3112_v33, %v3112_v33  ;;  %v3062_v62 = vunpack.c.h.bf16 %v4071_v27 }
 0x35a   : > { %3275 = vst.msk [vmem:[%s5033_s27 + $0x2c] sm:$0xf] %vm3263_vm1, %v3523_v31 }
 0x35b   : > { %3273 = vst.msk [vmem:[%s5033_s27 + $0x24] sm:$0xf] %vm3263_vm1, %v3521_v13  ;;  %v3060_v13 = vunpack.c.h.bf16 %v4072_v50 }
 0x35f   : > { %v3833_v28 = vpop.f32.mrb[140].mxu0 }
 0x360   : > { %v2969_v39 = vadd.f32 %v3833_v28, %v5020_v32  ;;  %v2960_v60 = vpop.f32.mrb[141].mxu0 }
 0x361   : > { %v2961_v49 = vadd.f32 %v5020_v32, %v2960_v60  ;;  %v3834_v38 = vpop.f32.mrb[142].mxu0 }
 0x362   : > { %v3085_v54 = vadd.f32 %v3053_v4, %v2969_v39  ;;  %v2972_v11 = vadd.f32 %v3834_v38, %v5020_v32  ;;  %v2963_v46 = vpop.f32.mrb[143].mxu0 }
 0x363   : > { %v3083_v24 = vadd.f32 %v3051_v41, %v2961_v49  ;;  %v2964_v42 = vadd.f32 %v5020_v32, %v2963_v46 }
 0x364   : > { %v3117_v20 = vmax.f32 %v3085_v54, 0.0  ;;  %v3086_v40 = vadd.f32 %v3054_v5, %v2972_v11 }
 0x365   : > { %v3115_v30 = vmax.f32 %v3083_v24, 0.0  ;;  %v3084_v12 = vadd.f32 %v3052_v29, %v2964_v42  ;;  %v4073_v42 = vld [vmem:[%s4157_s16 + $0x68] sm:$0xff]  }
 0x366   : > { %v3526_v0 = vpack.c.bf16 %v3117_v20, %v3117_v20  ;;  %v3118_v61 = vmax.f32 %v3086_v40, 0.0  ;;  %v3065_v20 = vunpack.c.l.bf16 %v4073_v42 }
 0x367   : > { %v3524_v10 = vpack.c.bf16 %v3115_v30, %v3115_v30  ;;  %v3116_v63 = vmax.f32 %v3084_v12, 0.0  ;;  %v4074_v30 = vld [vmem:[%s4157_s16 + $0x60] sm:$0xff]  }
 0x368   : > { %3278 = vst.msk [vmem:[%s5033_s27 + $0x38] sm:$0xf] %vm3263_vm1, %v3526_v0  ;;  %v3527_v2 = vpack.c.bf16 %v3118_v61, %v3118_v61  ;;  %v3063_v12 = vunpack.c.l.bf16 %v4074_v30 }
 0x369   : > { %3276 = vst.msk [vmem:[%s5033_s27 + $0x30] sm:$0xf] %vm3263_vm1, %v3524_v10  ;;  %v3525_v23 = vpack.c.bf16 %v3116_v63, %v3116_v63  ;;  %v3066_v10 = vunpack.c.h.bf16 %v4073_v42 }
 0x36a   : > { %3279 = vst.msk [vmem:[%s5033_s27 + $0x3c] sm:$0xf] %vm3263_vm1, %v3527_v2 }
 0x36b   : > { %3277 = vst.msk [vmem:[%s5033_s27 + $0x34] sm:$0xf] %vm3263_vm1, %v3525_v23  ;;  %v3064_v23 = vunpack.c.h.bf16 %v4074_v30 }
 0x36e   : > { %v3837_v7 = vpop.f32.mrb[144].mxu0 }
 0x36f   : > { %v2985_v36 = vadd.f32 %v3837_v7, %v5020_v32  ;;  %v2976_v17 = vpop.f32.mrb[145].mxu0 }
 0x370   : > { %v2977_v14 = vadd.f32 %v5020_v32, %v2976_v17  ;;  %v3838_v53 = vpop.f32.mrb[146].mxu0 }
 0x371   : > { %v3089_v3 = vadd.f32 %v3057_v56, %v2985_v36  ;;  %v2988_v21 = vadd.f32 %v3838_v53, %v5020_v32  ;;  %v2979_v1 = vpop.f32.mrb[147].mxu0 }
 0x372   : > { %v3087_v44 = vadd.f32 %v3055_v9, %v2977_v14  ;;  %v2980_v15 = vadd.f32 %v5020_v32, %v2979_v1 }
 0x373   : > { %v3121_v57 = vmax.f32 %v3089_v3, 0.0  ;;  %v3090_v59 = vadd.f32 %v3058_v16, %v2988_v21 }
 0x374   : > { %v3119_v8 = vmax.f32 %v3087_v44, 0.0  ;;  %v3088_v34 = vadd.f32 %v3056_v47, %v2980_v15  ;;  %v4075_v15 = vld [vmem:[%s4157_s16 + $0x78] sm:$0xff]  }
 0x375   : > { %v3530_v58 = vpack.c.bf16 %v3121_v57, %v3121_v57  ;;  %v3122_v52 = vmax.f32 %v3090_v59, 0.0  ;;  %v3069_v57 = vunpack.c.l.bf16 %v4075_v15 }
 0x376   : > { %v3528_v37 = vpack.c.bf16 %v3119_v8, %v3119_v8  ;;  %v3120_v18 = vmax.f32 %v3088_v34, 0.0  ;;  %v4076_v8 = vld [vmem:[%s4157_s16 + $0x70] sm:$0xff]  }
 0x377   : > { %3282 = vst.msk [vmem:[%s5033_s27 + $0x48] sm:$0xf] %vm3263_vm1, %v3530_v58  ;;  %v3531_v22 = vpack.c.bf16 %v3122_v52, %v3122_v52  ;;  %v3067_v34 = vunpack.c.l.bf16 %v4076_v8 }
 0x378   : > { %3280 = vst.msk [vmem:[%s5033_s27 + $0x40] sm:$0xf] %vm3263_vm1, %v3528_v37  ;;  %v3529_v55 = vpack.c.bf16 %v3120_v18, %v3120_v18  ;;  %v3070_v37 = vunpack.c.h.bf16 %v4075_v15 }
 0x379   : > { %3283 = vst.msk [vmem:[%s5033_s27 + $0x4c] sm:$0xf] %vm3263_vm1, %v3531_v22 }
 0x37a   : > { %3281 = vst.msk [vmem:[%s5033_s27 + $0x44] sm:$0xf] %vm3263_vm1, %v3529_v55  ;;  %v3068_v55 = vunpack.c.h.bf16 %v4076_v8 }
 0x37e   : > { %v3841_v51 = vpop.f32.mrb[148].mxu0 }
 0x37f   : > { %v3001_v25 = vadd.f32 %v3841_v51, %v5020_v32  ;;  %v2992_v48 = vpop.f32.mrb[149].mxu0 }
 0x380   : > { %v2993_v33 = vadd.f32 %v5020_v32, %v2992_v48  ;;  %v3842_v31 = vpop.f32.mrb[150].mxu0 }
 0x381   : > { %v3093_v19 = vadd.f32 %v3061_v26, %v3001_v25  ;;  %v3004_v4 = vadd.f32 %v3842_v31, %v5020_v32  ;;  %v2995_v28 = vpop.f32.mrb[151].mxu0 }
 0x382   : > { %v3091_v43 = vadd.f32 %v3059_v35, %v2993_v33  ;;  %v2996_v41 = vadd.f32 %v5020_v32, %v2995_v28 }
 0x383   : > { %v3125_v39 = vmax.f32 %v3093_v19, 0.0  ;;  %v3094_v60 = vadd.f32 %v3062_v62, %v3004_v4 }
 0x384   : > { %v3123_v5 = vmax.f32 %v3091_v43, 0.0  ;;  %v3092_v49 = vadd.f32 %v3060_v13, %v2996_v41 }
 0x385   : > { %v3534_v38 = vpack.c.bf16 %v3125_v39, %v3125_v39  ;;  %v3126_v29 = vmax.f32 %v3094_v60, 0.0 }
 0x386   : > { %v3532_v54 = vpack.c.bf16 %v3123_v5, %v3123_v5  ;;  %v3124_v11 = vmax.f32 %v3092_v49, 0.0 }
 0x387   : > { %3286 = vst.msk [vmem:[%s5033_s27 + $0x58] sm:$0xf] %vm3263_vm1, %v3534_v38  ;;  %v3535_v46 = vpack.c.bf16 %v3126_v29, %v3126_v29 }
 0x388   : > { %3284 = vst.msk [vmem:[%s5033_s27 + $0x50] sm:$0xf] %vm3263_vm1, %v3532_v54  ;;  %v3533_v24 = vpack.c.bf16 %v3124_v11, %v3124_v11 }
 0x389   : > { %3287 = vst.msk [vmem:[%s5033_s27 + $0x5c] sm:$0xf] %vm3263_vm1, %v3535_v46 }
 0x38a   : > { %3285 = vst.msk [vmem:[%s5033_s27 + $0x54] sm:$0xf] %vm3263_vm1, %v3533_v24 }
 0x38e   : > { %v3845_v40 = vpop.f32.mrb[152].mxu0 }
 0x38f   : > { %v3017_v0 = vadd.f32 %v3845_v40, %v5020_v32  ;;  %v3008_v61 = vpop.f32.mrb[153].mxu0 }
 0x390   : > { %v3009_v63 = vadd.f32 %v5020_v32, %v3008_v61  ;;  %v3846_v2 = vpop.f32.mrb[154].mxu0 }
 0x391   : > { %v3097_v45 = vadd.f32 %v3065_v20, %v3017_v0  ;;  %v3020_v56 = vadd.f32 %v3846_v2, %v5020_v32  ;;  %v3011_v7 = vpop.f32.mrb[155].mxu0 }
 0x392   : > { %v3095_v6 = vadd.f32 %v3063_v12, %v3009_v63  ;;  %v3012_v9 = vadd.f32 %v5020_v32, %v3011_v7 }
 0x393   : > { %v3129_v36 = vmax.f32 %v3097_v45, 0.0  ;;  %v3098_v17 = vadd.f32 %v3066_v10, %v3020_v56 }
 0x394   : > { %v3127_v16 = vmax.f32 %v3095_v6, 0.0  ;;  %v3096_v14 = vadd.f32 %v3064_v23, %v3012_v9 }
 0x395   : > { %v3538_v53 = vpack.c.bf16 %v3129_v36, %v3129_v36  ;;  %v3130_v47 = vmax.f32 %v3098_v17, 0.0 }
 0x396   : > { %v3536_v3 = vpack.c.bf16 %v3127_v16, %v3127_v16  ;;  %v3128_v21 = vmax.f32 %v3096_v14, 0.0 }
 0x397   : > { %3290 = vst.msk [vmem:[%s5033_s27 + $0x68] sm:$0xf] %vm3263_vm1, %v3538_v53  ;;  %v3539_v1 = vpack.c.bf16 %v3130_v47, %v3130_v47 }
 0x398   : > { %3288 = vst.msk [vmem:[%s5033_s27 + $0x60] sm:$0xf] %vm3263_vm1, %v3536_v3  ;;  %v3537_v44 = vpack.c.bf16 %v3128_v21, %v3128_v21 }
 0x399   : > { %3291 = vst.msk [vmem:[%s5033_s27 + $0x6c] sm:$0xf] %vm3263_vm1, %v3539_v1 }
 0x39a   : > { %3289 = vst.msk [vmem:[%s5033_s27 + $0x64] sm:$0xf] %vm3263_vm1, %v3537_v44 }
 0x39e   : > { %v3849_v59 = vpop.f32.mrb[156].mxu0 }
 0x39f   : > { %v3033_v58 = vadd.f32 %v3849_v59, %v5020_v32  ;;  %v3024_v52 = vpop.f32.mrb[157].mxu0 }
 0x3a0   : > { %v3025_v18 = vadd.f32 %v5020_v32, %v3024_v52  ;;  %v3850_v22 = vpop.f32.mrb[158].mxu0 }
 0x3a1   : > { %v3101_v27 = vadd.f32 %v3069_v57, %v3033_v58  ;;  %v3036_v26 = vadd.f32 %v3850_v22, %v5020_v32  ;;  %v3027_v51 = vpop.f32.mrb[159].mxu0 }
 0x3a2   : > { %v3099_v50 = vadd.f32 %v3067_v34, %v3025_v18  ;;  %v3028_v35 = vadd.f32 %v5020_v32, %v3027_v51 }
 0x3a3   : > { %v3133_v25 = vmax.f32 %v3101_v27, 0.0  ;;  %v3102_v48 = vadd.f32 %v3070_v37, %v3036_v26 }
 0x3a4   : > { %v3131_v62 = vmax.f32 %v3099_v50, 0.0  ;;  %v3100_v33 = vadd.f32 %v3068_v55, %v3028_v35 }
 0x3a5   : > { %v3542_v31 = vpack.c.bf16 %v3133_v25, %v3133_v25  ;;  %v3134_v13 = vmax.f32 %v3102_v48, 0.0 }
 0x3a6   : > { %v3540_v19 = vpack.c.bf16 %v3131_v62, %v3131_v62  ;;  %v3132_v4 = vmax.f32 %v3100_v33, 0.0 }
 0x3a7   : > { %3294 = vst.msk [vmem:[%s5033_s27 + $0x78] sm:$0xf] %vm3263_vm1, %v3542_v31  ;;  %v3543_v28 = vpack.c.bf16 %v3134_v13, %v3134_v13 }
 0x3a8   : > { %3292 = vst.msk [vmem:[%s5033_s27 + $0x70] sm:$0xf] %vm3263_vm1, %v3540_v19  ;;  %v3541_v43 = vpack.c.bf16 %v3132_v4, %v3132_v4 }
 0x3a9   : > { %3295 = vst.msk [vmem:[%s5033_s27 + $0x7c] sm:$0xf] %vm3263_vm1, %v3543_v28 }
 0x3aa   : > { %3293 = vst.msk [vmem:[%s5033_s27 + $0x74] sm:$0xf] %vm3263_vm1, %v3541_v43 }
 0x3ab PF: > { %s17_s24 = sadd.s32 1, %s4083_s24  }
 0x3ac   : > { %p14_p4 = scmp.ge.s32.totalorder %s17_s24, 4  }
 0x3ae   :  { %16 = sbr.rel (!%p14_p4) target bundleno = 1 (0x1), region = 78 }

</bundles_post_ra>
